<compile_context>
chip_gen: v5e
topology: v5e:2x2
jax: 0.10.0
libtpu: 0.0.40
codegen_flags: <defaults>
</compile_context>

<pallas_src>
import functools

import jax
import jax.numpy as jnp
from jax import lax
from jax.experimental import pallas as pl
from jax.experimental.pallas import tpu as pltpu


def _round_up(a, b):
    return (a + b - 1) // b * b


def _tpu_vmem_and_align():
    """(tile VMEM budget, vmem_limit_bytes, MXU alignment) -- generation aware."""
    phys = 64 * 1024 * 1024                    # conservative default (v7x per-TC VMEM)
    try:
        phys = int(pltpu.get_tpu_info().vmem_capacity_bytes)
    except Exception:
        pass
    if phys < 16 * 1024 * 1024:
        phys = 64 * 1024 * 1024
    budget = min(int(phys * 0.45), 48 * 1024 * 1024)
    limit = min(int(phys * 0.75), 96 * 1024 * 1024)
    try:
        kind = jax.devices()[0].device_kind.lower()
    except Exception:
        kind = ""
    # v2-v5 MXUs are 128-wide; v6e/v7x are 2x256x256.
    align = 128 if any(t in kind for t in ("v2", "v3", "v4", "v5")) else 256
    return budget, limit, align


def _conv_stats_kernel(x_ref, w_ref, mask_ref, y_ref, sum_ref, ssq_ref, *, k, Wp, rows):
    """Per (image, Cout-tile): k*k tap matmuls accumulated in f32 (no scratch ref),
    bf16 conv output, and masked per-channel sum / sum-of-squares partials."""
    acc = None
    for t in range(k * k):                               # static unroll over taps
        di, dj = t // k, t % k
        off = di * Wp + dj                               # static element offset
        xs = x_ref[0, pl.ds(off, rows), :]               # (rows, Cin) bf16
        part = jnp.dot(xs, w_ref[t], preferred_element_type=jnp.float32)
        acc = part if acc is None else acc + part
    y_ref[0] = acc.astype(y_ref.dtype)                   # bf16 y halves HBM traffic
    accm = acc * mask_ref[...]                           # zero padded-width columns
    s = jnp.sum(accm, axis=0, keepdims=True)             # (1, tn)
    q = jnp.sum(accm * acc, axis=0, keepdims=True)       # sum(acc^2) over valid rows
    # Replicate across the 8 sublanes of this tile's partial-stat block; the
    # wrapper reads sublane 0 of each tile.
    sum_ref[...] = jnp.broadcast_to(s, sum_ref.shape)
    ssq_ref[...] = jnp.broadcast_to(q, ssq_ref.shape)


def _bn_act_kernel(y_ref, scale_ref, shift_ref, o_ref, *, relu):
    o = y_ref[0].astype(jnp.float32) * scale_ref[0] + shift_ref[0]
    if relu:
        o = jnp.maximum(o, 0.0)
    o_ref[0] = o.astype(o_ref.dtype)


def conv_bn(x_nchw, weight, gamma, beta, *, kernel_size=1, padding='SAME',
            activation='relu', eps=1e-5, out_dtype=jnp.bfloat16, out_layout='NCHW'):
    """Forward pass of ConvBN. x_nchw: [N, Cin, H, W]; weight: [Cout, Cin, k, k]."""
    N, Cin, H, W = x_nchw.shape
    Cout = weight.shape[0]
    k = int(kernel_size)
    # NOTE: 'SAME' math assumes odd kernel sizes (mirrors the module's (k-1)//2).
    pad = (k - 1) // 2 if padding == 'SAME' else 0

    Ho = H + 2 * pad - k + 1
    Wo = W + 2 * pad - k + 1
    Wp = W + 2 * pad
    extra = 1 if k > 1 else 0            # spare zero row so tap offsets never read OOB
    Hpa = H + 2 * pad + extra
    rows = Ho * Wp                       # matmul M rows per image (full padded width)
    count = N * Ho * Wo                  # true per-channel element count for BN stats

    budget, vmem_limit, align = _tpu_vmem_and_align()
    Coutp = _round_up(Cout, 128) if Cout <= 128 else _round_up(Cout, align)

    # ---- input prep: one fused NCHW->NHWC(bf16) pass + tiny spatial zero-pad ----
    x = jnp.transpose(x_nchw, (0, 2, 3, 1)).astype(jnp.bfloat16)
    if pad or extra:
        x = jnp.pad(x, ((0, 0), (pad, pad + extra), (pad, pad), (0, 0)))
    xflat = x.reshape(N, Hpa * Wp, Cin)                           # free reshape

    # [Cout,Cin,kH,kW] -> [k*k, Cin, Coutp]  (tap-major: t = di*k + dj)
    wtaps = jnp.transpose(weight, (2, 3, 1, 0)).reshape(k * k, Cin, Cout)
    wtaps = jnp.pad(wtaps, ((0, 0), (0, 0), (0, Coutp - Cout))).astype(jnp.bfloat16)

    # Rows with w >= Wo are padded-width garbage: excluded from stats, dropped later.
    mask = jnp.tile((jnp.arange(Wp) < Wo).astype(jnp.float32), Ho).reshape(rows, 1)

    # ---- Cout tiling: keep whole image + weights resident, tile channels if needed ----
    def _vmem1(tn_):
        return (2 * Hpa * Wp * Cin * 2          # x (bf16, double buffered)
                + 2 * k * k * Cin * tn_ * 2     # weights (bf16)
                + 2 * rows * tn_ * 2            # y out (bf16)
                + rows * tn_ * 4                # f32 accumulator (live value)
                + 4 * 8 * tn_ * 4               # stat partials
                + 2 * rows * 4)                 # mask

    tn = Coutp
    while _vmem1(tn) > budget and tn > 128:
        tn = max(128, _round_up(tn // 2, 128))
    n_steps = -(-Coutp // tn)

    cost = pl.CostEstimate(
        flops=int(2 * N * rows * k * k * Cin * Coutp),
        transcendentals=0,
        bytes_accessed=int(N * Hpa * Wp * Cin * 2 + N * n_steps * k * k * Cin * tn * 2
                           + N * rows * Coutp * 2 + 4 * N * 8 * Coutp * 4))

    # ---- kernel 1: tap-decomposed conv (bf16 -> f32 acc) + BN batch-stat partials ----
    y, psum, pssq = pl.pallas_call(
        functools.partial(_conv_stats_kernel, k=k, Wp=Wp, rows=rows),
        out_shape=(jax.ShapeDtypeStruct((N, rows, Coutp), jnp.bfloat16),
                   jax.ShapeDtypeStruct((N * 8, Coutp), jnp.float32),
                   jax.ShapeDtypeStruct((N * 8, Coutp), jnp.float32)),
        grid_spec=pltpu.PrefetchScalarGridSpec(
            num_scalar_prefetch=0,
            grid=(N, n_steps),
            in_specs=[pl.BlockSpec((1, Hpa * Wp, Cin), lambda n, j: (n, 0, 0)),
                      pl.BlockSpec((k * k, Cin, tn), lambda n, j: (0, 0, j)),
                      pl.BlockSpec((rows, 1), lambda n, j: (0, 0))],
            out_specs=(pl.BlockSpec((1, rows, tn), lambda n, j: (n, 0, j)),
                       pl.BlockSpec((8, tn), lambda n, j: (n, j)),
                       pl.BlockSpec((8, tn), lambda n, j: (n, j)))),
        compiler_params=pltpu.CompilerParams(
            dimension_semantics=("parallel", "parallel"),
            vmem_limit_bytes=vmem_limit),
        cost_estimate=cost,
    )(xflat, wtaps, mask)

    # ---- fold training-mode BN into per-channel scale/shift (tiny f32 glue) ----
    csum = psum.reshape(N, 8, Coutp)[:, 0, :].sum(axis=0)
    cssq = pssq.reshape(N, 8, Coutp)[:, 0, :].sum(axis=0)
    mean = csum / count
    # Biased var (like BN training normalization); clamp guards cancellation drift.
    var = jnp.maximum(cssq / count - mean * mean, 0.0)
    gamma_p = jnp.pad(gamma.astype(jnp.float32).reshape(-1), (0, Coutp - Cout))
    beta_p = jnp.pad(beta.astype(jnp.float32).reshape(-1), (0, Coutp - Cout))
    inv = lax.rsqrt(var + eps)
    scale = (gamma_p * inv).reshape(1, 1, Coutp)
    shift = (beta_p - mean * gamma_p * inv).reshape(1, 1, Coutp)

    # ---- kernel 2: BN affine + ReLU, bf16 in / bf16 out, aliased onto y ----
    alias = {0: 0} if out_dtype == jnp.bfloat16 else {}
    out = pl.pallas_call(
        functools.partial(_bn_act_kernel, relu=(activation == 'relu')),
        out_shape=jax.ShapeDtypeStruct((N, rows, Coutp), out_dtype),
        grid_spec=pltpu.PrefetchScalarGridSpec(
            num_scalar_prefetch=0,
            grid=(N, n_steps),
            in_specs=[pl.BlockSpec((1, rows, tn), lambda n, j: (n, 0, j)),
                      pl.BlockSpec((1, 1, tn), lambda n, j: (0, 0, j)),
                      pl.BlockSpec((1, 1, tn), lambda n, j: (0, 0, j))],
            out_specs=pl.BlockSpec((1, rows, tn), lambda n, j: (n, 0, j))),
        compiler_params=pltpu.CompilerParams(
            dimension_semantics=("parallel", "parallel"),
            vmem_limit_bytes=vmem_limit),
        input_output_aliases=alias,
    )(y, scale, shift)

    # ---- drop padded width / channels; one bf16 layout pass back to NCHW ----
    out = out.reshape(N, Ho, Wp, Coutp)[:, :, :Wo, :Cout]
    if out_layout == 'NCHW':
        out = jnp.transpose(out, (0, 3, 1, 2))
    return out


def _reference(x, w, gamma, beta, *, kernel_size, padding, activation, eps=1e-5):
    # Mirrors kernel numerics: bf16 conv operands, f32 accumulation/stats,
    # bf16-rounded conv output before the BN affine.
    pad = (kernel_size - 1) // 2 if padding == 'SAME' else 0
    y = lax.conv_general_dilated(
        x.astype(jnp.bfloat16), w.astype(jnp.bfloat16), (1, 1),
        [(pad, pad), (pad, pad)],
        dimension_numbers=('NCHW', 'OIHW', 'NCHW'),
        preferred_element_type=jnp.float32)
    mean = y.mean(axis=(0, 2, 3), keepdims=True)
    var = y.var(axis=(0, 2, 3), keepdims=True)           # biased, like BN training
    yb = y.astype(jnp.bfloat16).astype(jnp.float32)
    out = (yb - mean) * lax.rsqrt(var + eps)
    out = out * gamma.reshape(1, -1, 1, 1) + beta.reshape(1, -1, 1, 1)
    if activation == 'relu':
        out = jnp.maximum(out, 0.0)
    return out


if __name__ == "__main__":
    key = jax.random.PRNGKey(0)
    kx, kw1, kw3, kg, kb = jax.random.split(key, 5)

    N, Cin, H, W = 2, 4, 16, 16
    Cout = 8
    x = jax.random.normal(kx, (N, Cin, H, W), dtype=jnp.float32)

    gamma = 1.0 + 0.1 * jax.random.normal(kg, (Cout,), dtype=jnp.float32)
    beta = 0.1 * jax.random.normal(kb, (Cout,), dtype=jnp.float32)

    ok = True
    for ks, wkey in ((1, kw1), (3, kw3)):
        w = jax.random.normal(wkey, (Cout, Cin, ks, ks), dtype=jnp.float32) * 0.2
        fwd = jax.jit(functools.partial(conv_bn, kernel_size=ks, padding='SAME',
                                        activation='relu'))
        got = jax.block_until_ready(fwd(x, w, gamma, beta))
        want = _reference(x, w, gamma, beta, kernel_size=ks, padding='SAME',
                          activation='relu')
        # 2e-2 tolerance absorbs the bf16 output / bf16 y-intermediate rounding.
        ok = ok and bool(jnp.allclose(got.astype(jnp.float32), want,
                                      rtol=2e-2, atol=2e-2))

    print("KERNEL_OK" if ok else "MISMATCH")
</pallas_src>

<mosaic_0001>
module attributes {stable_mosaic.version = 11 : i64} {
  func.func @_conv_stats_kernel(%arg0: i32, %arg1: i32, %arg2: memref<1x256x4xbf16, #tpu.memory_space<vmem>>, %arg3: memref<1x4x128xbf16, #tpu.memory_space<vmem>>, %arg4: memref<256x1xf32, #tpu.memory_space<vmem>>, %arg5: memref<1x256x128xbf16, #tpu.memory_space<vmem>>, %arg6: memref<8x128xf32, #tpu.memory_space<vmem>>, %arg7: memref<8x128xf32, #tpu.memory_space<vmem>>) attributes {dimension_semantics = [#tpu.dimension_semantics<parallel>, #tpu.dimension_semantics<parallel>], iteration_bounds = array<i64: 2, 1>, scalar_prefetch = 0 : i64, scratch_operands = 0 : i64, tpu.core_type = #tpu.core_type<tc>, window_params = [{transform_indices = @transform_0, window_bounds = array<i64: 1, 256, 4>}, {transform_indices = @transform_1, window_bounds = array<i64: 1, 4, 128>}, {pipeline_mode = #tpu.pipeline_mode<synchronous>, transform_indices = @transform_2, window_bounds = array<i64: 256, 1>}, {transform_indices = @transform_3, window_bounds = array<i64: 1, 256, 128>}, {transform_indices = @transform_4, window_bounds = array<i64: 8, 128>}, {transform_indices = @transform_5, window_bounds = array<i64: 8, 128>}]} {
    %c0 = arith.constant 0 : index
    %c0_0 = arith.constant 0 : index
    %c0_1 = arith.constant 0 : index
    %0 = vector.load %arg2[%c0, %c0_0, %c0_1] : memref<1x256x4xbf16, #tpu.memory_space<vmem>>, vector<1x256x4xbf16>
    %1 = vector.shape_cast %0 : vector<1x256x4xbf16> to vector<256x4xbf16>
    %c0_2 = arith.constant 0 : index
    %c0_3 = arith.constant 0 : index
    %c0_4 = arith.constant 0 : index
    %2 = vector.load %arg3[%c0_2, %c0_3, %c0_4] : memref<1x4x128xbf16, #tpu.memory_space<vmem>>, vector<1x4x128xbf16>
    %3 = vector.shape_cast %2 : vector<1x4x128xbf16> to vector<4x128xbf16>
    %cst = arith.constant dense<0.000000e+00> : vector<256x128xf32>
    %4 = tpu.matmul %1, %3, %cst {dimension_numbers = #tpu.dot_dimension_numbers<[1], [0], [0], [1], [0, 0, 1, 1], [], []>} : vector<256x4xbf16>, vector<4x128xbf16>, vector<256x128xf32> -> vector<256x128xf32>
    %5 = arith.truncf %4 : vector<256x128xf32> to vector<256x128xbf16>
    %c0_5 = arith.constant 0 : index
    %c0_6 = arith.constant 0 : index
    %c0_7 = arith.constant 0 : index
    %6 = vector.load %arg5[%c0_5, %c0_6, %c0_7] : memref<1x256x128xbf16, #tpu.memory_space<vmem>>, vector<1x256x128xbf16>
    %7 = vector.shape_cast %6 : vector<1x256x128xbf16> to vector<256x128xbf16>
    %8 = vector.shape_cast %5 : vector<256x128xbf16> to vector<1x256x128xbf16>
    tpu.vector_store %arg5[%c0_5, %c0_6, %c0_7], %8 {strides = array<i32>} : memref<1x256x128xbf16, #tpu.memory_space<vmem>>, vector<1x256x128xbf16>,
    %c0_8 = arith.constant 0 : index
    %c0_9 = arith.constant 0 : index
    %9 = vector.load %arg4[%c0_8, %c0_9] : memref<256x1xf32, #tpu.memory_space<vmem>>, vector<256x1xf32>
    %10 = vector.broadcast %9 : vector<256x1xf32> to vector<256x128xf32>
    %11 = arith.mulf %4, %10 : vector<256x128xf32>
    %cst_10 = arith.constant dense<0.000000e+00> : vector<128xf32>
    %12 = vector.multi_reduction <add>, %11, %cst_10 [0] : vector<256x128xf32> to vector<128xf32>
    %13 = vector.shape_cast %12 : vector<128xf32> to vector<1x128xf32>
    %14 = arith.mulf %11, %4 : vector<256x128xf32>
    %cst_11 = arith.constant dense<0.000000e+00> : vector<128xf32>
    %15 = vector.multi_reduction <add>, %14, %cst_11 [0] : vector<256x128xf32> to vector<128xf32>
    %16 = vector.shape_cast %15 : vector<128xf32> to vector<1x128xf32>
    %17 = vector.shape_cast %13 : vector<1x128xf32> to vector<1x128xf32>
    %18 = vector.broadcast %17 : vector<1x128xf32> to vector<8x128xf32>
    %c0_12 = arith.constant 0 : index
    %c0_13 = arith.constant 0 : index
    %19 = vector.load %arg6[%c0_12, %c0_13] : memref<8x128xf32, #tpu.memory_space<vmem>>, vector<8x128xf32>
    tpu.vector_store %arg6[%c0_12, %c0_13], %18 {strides = array<i32>} : memref<8x128xf32, #tpu.memory_space<vmem>>, vector<8x128xf32>,
    %20 = vector.shape_cast %16 : vector<1x128xf32> to vector<1x128xf32>
    %21 = vector.broadcast %20 : vector<1x128xf32> to vector<8x128xf32>
    %c0_14 = arith.constant 0 : index
    %c0_15 = arith.constant 0 : index
    %22 = vector.load %arg7[%c0_14, %c0_15] : memref<8x128xf32, #tpu.memory_space<vmem>>, vector<8x128xf32>
    tpu.vector_store %arg7[%c0_14, %c0_15], %21 {strides = array<i32>} : memref<8x128xf32, #tpu.memory_space<vmem>>, vector<8x128xf32>,
    return
  }
  func.func @transform_0(%arg0: i32, %arg1: i32) -> (i32, i32, i32) {
    %c0_i32 = arith.constant 0 : i32
    %c0_i32_0 = arith.constant 0 : i32
    %c0_i32_1 = arith.constant 0 : i32
    return %arg0, %c0_i32, %c0_i32_0 : i32, i32, i32
  }
  func.func @transform_1(%arg0: i32, %arg1: i32) -> (i32, i32, i32) {
    %c0_i32 = arith.constant 0 : i32
    %c0_i32_0 = arith.constant 0 : i32
    %c0_i32_1 = arith.constant 0 : i32
    return %c0_i32, %c0_i32_0, %arg1 : i32, i32, i32
  }
  func.func @transform_2(%arg0: i32, %arg1: i32) -> (i32, i32) {
    %c0_i32 = arith.constant 0 : i32
    %c0_i32_0 = arith.constant 0 : i32
    %c0_i32_1 = arith.constant 0 : i32
    return %c0_i32, %c0_i32_0 : i32, i32
  }
  func.func @transform_3(%arg0: i32, %arg1: i32) -> (i32, i32, i32) {
    %c0_i32 = arith.constant 0 : i32
    %c0_i32_0 = arith.constant 0 : i32
    return %arg0, %c0_i32, %arg1 : i32, i32, i32
  }
  func.func @transform_4(%arg0: i32, %arg1: i32) -> (i32, i32) {
    %c0_i32 = arith.constant 0 : i32
    return %arg0, %arg1 : i32, i32
  }
  func.func @transform_5(%arg0: i32, %arg1: i32) -> (i32, i32) {
    %c0_i32 = arith.constant 0 : i32
    return %arg0, %arg1 : i32, i32
  }
}

module attributes {stable_mosaic.version = 11 : i64} {
  func.func @_bn_act_kernel(%arg0: i32, %arg1: i32, %arg2: memref<1x256x128xbf16, #tpu.memory_space<vmem>>, %arg3: memref<1x1x128xf32, #tpu.memory_space<vmem>>, %arg4: memref<1x1x128xf32, #tpu.memory_space<vmem>>, %arg5: memref<1x256x128xbf16, #tpu.memory_space<vmem>>) attributes {dimension_semantics = [#tpu.dimension_semantics<parallel>, #tpu.dimension_semantics<parallel>], iteration_bounds = array<i64: 2, 1>, scalar_prefetch = 0 : i64, scratch_operands = 0 : i64, tpu.core_type = #tpu.core_type<tc>, window_params = [{transform_indices = @transform_0, window_bounds = array<i64: 1, 256, 128>}, {transform_indices = @transform_1, window_bounds = array<i64: 1, 1, 128>}, {transform_indices = @transform_2, window_bounds = array<i64: 1, 1, 128>}, {transform_indices = @transform_3, window_bounds = array<i64: 1, 256, 128>}]} {
    %c0 = arith.constant 0 : index
    %c0_0 = arith.constant 0 : index
    %c0_1 = arith.constant 0 : index
    %0 = vector.load %arg2[%c0, %c0_0, %c0_1] : memref<1x256x128xbf16, #tpu.memory_space<vmem>>, vector<1x256x128xbf16>
    %1 = vector.shape_cast %0 : vector<1x256x128xbf16> to vector<256x128xbf16>
    %2 = arith.extf %1 : vector<256x128xbf16> to vector<256x128xf32>
    %c0_2 = arith.constant 0 : index
    %c0_3 = arith.constant 0 : index
    %c0_4 = arith.constant 0 : index
    %3 = vector.load %arg3[%c0_2, %c0_3, %c0_4] : memref<1x1x128xf32, #tpu.memory_space<vmem>>, vector<1x1x128xf32>
    %4 = vector.shape_cast %3 : vector<1x1x128xf32> to vector<1x128xf32>
    %5 = vector.broadcast %4 : vector<1x128xf32> to vector<256x128xf32>
    %6 = arith.mulf %2, %5 : vector<256x128xf32>
    %c0_5 = arith.constant 0 : index
    %c0_6 = arith.constant 0 : index
    %c0_7 = arith.constant 0 : index
    %7 = vector.load %arg4[%c0_5, %c0_6, %c0_7] : memref<1x1x128xf32, #tpu.memory_space<vmem>>, vector<1x1x128xf32>
    %8 = vector.shape_cast %7 : vector<1x1x128xf32> to vector<1x128xf32>
    %9 = vector.broadcast %8 : vector<1x128xf32> to vector<256x128xf32>
    %10 = arith.addf %6, %9 : vector<256x128xf32>
    %cst = arith.constant 0.000000e+00 : f32
    %11 = vector.broadcast %cst : f32 to vector<256x128xf32>
    %12 = arith.maximumf %10, %11 : vector<256x128xf32>
    %13 = arith.truncf %12 : vector<256x128xf32> to vector<256x128xbf16>
    %c0_8 = arith.constant 0 : index
    %c0_9 = arith.constant 0 : index
    %c0_10 = arith.constant 0 : index
    %14 = vector.load %arg5[%c0_8, %c0_9, %c0_10] : memref<1x256x128xbf16, #tpu.memory_space<vmem>>, vector<1x256x128xbf16>
    %15 = vector.shape_cast %14 : vector<1x256x128xbf16> to vector<256x128xbf16>
    %16 = vector.shape_cast %13 : vector<256x128xbf16> to vector<1x256x128xbf16>
    tpu.vector_store %arg5[%c0_8, %c0_9, %c0_10], %16 {strides = array<i32>} : memref<1x256x128xbf16, #tpu.memory_space<vmem>>, vector<1x256x128xbf16>,
    return
  }
  func.func @transform_0(%arg0: i32, %arg1: i32) -> (i32, i32, i32) {
    %c0_i32 = arith.constant 0 : i32
    %c0_i32_0 = arith.constant 0 : i32
    return %arg0, %c0_i32, %arg1 : i32, i32, i32
  }
  func.func @transform_1(%arg0: i32, %arg1: i32) -> (i32, i32, i32) {
    %c0_i32 = arith.constant 0 : i32
    %c0_i32_0 = arith.constant 0 : i32
    %c0_i32_1 = arith.constant 0 : i32
    return %c0_i32, %c0_i32_0, %arg1 : i32, i32, i32
  }
  func.func @transform_2(%arg0: i32, %arg1: i32) -> (i32, i32, i32) {
    %c0_i32 = arith.constant 0 : i32
    %c0_i32_0 = arith.constant 0 : i32
    %c0_i32_1 = arith.constant 0 : i32
    return %c0_i32, %c0_i32_0, %arg1 : i32, i32, i32
  }
  func.func @transform_3(%arg0: i32, %arg1: i32) -> (i32, i32, i32) {
    %c0_i32 = arith.constant 0 : i32
    %c0_i32_0 = arith.constant 0 : i32
    return %arg0, %c0_i32, %arg1 : i32, i32, i32
  }
}

</mosaic_0001>

<bundles_post_ra>
// kernel: tile.8
= control target key start
LH: loop header
LB: loop body
LE: loop exit
PB: predicated region body
PF: predicated region fallthrough
CT: control target
= control target key end

     0   :  { %s28_s0 = inlined_call_operand.vmem [shape: f32[16], index: 0, kind: input, shape index: {}]   ;;  %s29_s1 = inlined_call_operand.vmem [shape: f32[16,16], index: 1, kind: output, shape index: {}]  }
   0x1   :  { %v4_v0 = vld [vmem:[%s28_s0] ss:$0 sm:$0xff] }
   0x2   :  { %5 = vst [vmem:[%s29_s1] sm:$0xff] %v4_v0 }
   0x3   :  { %8 = vst [vmem:[%s29_s1 + $0x8] sm:$0xff] %v4_v0 }

// kernel: tile.0
= control target key start
LH: loop header
LB: loop body
LE: loop exit
PB: predicated region body
PF: predicated region fallthrough
CT: control target
= control target key end

     0   :  { %s549_s8 = smov 126   ;;  %s550_s9 = smov 127   ;;  %vm3_vm0 = vcmask 7168   ;;  %s1092_s0 = inlined_call_operand.vmem [shape: f32[16,16], index: 0, kind: input, shape index: {}]   ;;  %s1093_s1 = inlined_call_operand.vmem [shape: f32[256,1], index: 1, kind: output, shape index: {}]  }
   0x1   :  { %v44_v0 = vld [vmem:[%s1092_s0] sm:$0xff]   ;;  %s551_s10 = smov 125   ;;  %v412_v1 = vld [vmem:[%s1092_s0 + $0x8] sm:$0xff]   ;;  %s552_s0 = smov 124  }
   0x2   :  { %45 = vrot.lane.b32.xlu1 %v44_v0, %s549_s8  ;;  %20 = vrot.lane.b32.xlu0 %v44_v0, %s550_s9  ;;  %s553_s13 = smov 123   ;;  %s554_s14 = smov 122   ;;  %4 = vst.msk [vmem:[%s1093_s1] ss:$16 sm:$0x3] %vm3_vm0, %v44_v0  }
   0x3   :  { %70 = vrot.lane.b32.xlu2 %v44_v0, %s551_s10  ;;  %s555_s15 = smov 121   ;;  %s556_s16 = smov 120   ;;  %5 = vst.msk [vmem:[%s1093_s1] ss:$16 sm:$0xc] %vm3_vm0, %v44_v0  }
   0x4   :  { %s557_s17 = smov 119   ;;  %6 = vst.msk [vmem:[%s1093_s1] ss:$16 sm:$0x30] %vm3_vm0, %v44_v0   ;;  %s558_s30 = smov 118  }
   0x5   :  { %7 = vst.msk [vmem:[%s1093_s1] ss:$16 sm:$0xc0] %vm3_vm0, %v44_v0   ;;  %s559_s4 = smov 117   ;;  %s560_s7 = smov 116  }
   0x6   :  { %395 = vst.msk [vmem:[%s1093_s1 + $0x80] ss:$16 sm:$0x3] %vm3_vm0, %v412_v1  }
   0x7   :  { %396 = vst.msk [vmem:[%s1093_s1 + $0x80] ss:$16 sm:$0xc] %vm3_vm0, %v412_v1  }
   0x8   :  { %397 = vst.msk [vmem:[%s1093_s1 + $0x80] ss:$16 sm:$0x30] %vm3_vm0, %v412_v1  }
   0x9   :  { %398 = vst.msk [vmem:[%s1093_s1 + $0x80] ss:$16 sm:$0xc0] %vm3_vm0, %v412_v1  }
   0xa   :  { %58 = vrot.lane.b32.xlu1 %v412_v1, %s549_s8  ;;  %33 = vrot.lane.b32.xlu0 %v412_v1, %s550_s9  ;;  %s561_s8 = smov 115   ;;  %s562_s9 = smov 114  }
   0xb   :  { %83 = vrot.lane.b32.xlu2 %v412_v1, %s551_s10  ;;  %s563_s10 = smov 113  }
  0x12   :  { %108 = vrot.lane.b32.xlu1 %v412_v1, %s552_s0  ;;  %95 = vrot.lane.b32.xlu0 %v44_v0, %s552_s0 }
  0x13   :  { %120 = vrot.lane.b32.xlu2 %v44_v0, %s553_s13 }
  0x1a   :  { %145 = vrot.lane.b32.xlu1 %v44_v0, %s554_s14  ;;  %133 = vrot.lane.b32.xlu0 %v412_v1, %s553_s13 }
  0x1b   :  { %158 = vrot.lane.b32.xlu2 %v412_v1, %s554_s14 }
  0x22   :  { %183 = vrot.lane.b32.xlu1 %v412_v1, %s555_s15  ;;  %170 = vrot.lane.b32.xlu0 %v44_v0, %s555_s15 }
  0x23   :  { %195 = vrot.lane.b32.xlu2 %v44_v0, %s556_s16 }
  0x2a   :  { %220 = vrot.lane.b32.xlu1 %v44_v0, %s557_s17  ;;  %208 = vrot.lane.b32.xlu0 %v412_v1, %s556_s16 }
  0x2b   :  { %233 = vrot.lane.b32.xlu2 %v412_v1, %s557_s17 }
  0x32   :  { %258 = vrot.lane.b32.xlu1 %v412_v1, %s558_s30  ;;  %245 = vrot.lane.b32.xlu0 %v44_v0, %s558_s30 }
  0x33   :  { %270 = vrot.lane.b32.xlu2 %v44_v0, %s559_s4 }
  0x3a   :  { %295 = vrot.lane.b32.xlu1 %v44_v0, %s560_s7  ;;  %283 = vrot.lane.b32.xlu0 %v412_v1, %s559_s4 }
  0x3b   :  { %308 = vrot.lane.b32.xlu2 %v412_v1, %s560_s7 }
  0x42   :  { %333 = vrot.lane.b32.xlu1 %v412_v1, %s561_s8  ;;  %320 = vrot.lane.b32.xlu0 %v44_v0, %s561_s8 }
  0x43   :  { %345 = vrot.lane.b32.xlu2 %v44_v0, %s562_s9 }
  0x4a   :  { %370 = vrot.lane.b32.xlu1 %v44_v0, %s563_s10  ;;  %358 = vrot.lane.b32.xlu0 %v412_v1, %s562_s9 }
  0x4b   :  { %383 = vrot.lane.b32.xlu2 %v412_v1, %s563_s10 }
  0x5d   :  { %v71_v2 = vpop.permute.xlu2 %70  }
  0x5e   :  { %417 = vst.msk [vmem:[%s1093_s1 + $0x3] ss:$16 sm:$0x3] %vm3_vm0, %v71_v2  }
  0x5f   :  { %418 = vst.msk [vmem:[%s1093_s1 + $0x3] ss:$16 sm:$0xc] %vm3_vm0, %v71_v2  }
  0x60   :  { %419 = vst.msk [vmem:[%s1093_s1 + $0x3] ss:$16 sm:$0x30] %vm3_vm0, %v71_v2  }
  0x61   :  { %420 = vst.msk [vmem:[%s1093_s1 + $0x3] ss:$16 sm:$0xc0] %vm3_vm0, %v71_v2  }
  0x65   :  { %v84_v3 = vpop.permute.xlu2 %83  }
  0x66   :  { %422 = vst.msk [vmem:[%s1093_s1 + $0x83] ss:$16 sm:$0x3] %vm3_vm0, %v84_v3  }
  0x67   :  { %423 = vst.msk [vmem:[%s1093_s1 + $0x83] ss:$16 sm:$0xc] %vm3_vm0, %v84_v3  }
  0x68   :  { %424 = vst.msk [vmem:[%s1093_s1 + $0x83] ss:$16 sm:$0x30] %vm3_vm0, %v84_v3  }
  0x69   :  { %425 = vst.msk [vmem:[%s1093_s1 + $0x83] ss:$16 sm:$0xc0] %vm3_vm0, %v84_v3  }
  0x6d   :  { %v121_v4 = vpop.permute.xlu2 %120  }
  0x6e   :  { %435 = vst.msk [vmem:[%s1093_s1 + $0x5] ss:$16 sm:$0x3] %vm3_vm0, %v121_v4  }
  0x6f   :  { %436 = vst.msk [vmem:[%s1093_s1 + $0x5] ss:$16 sm:$0xc] %vm3_vm0, %v121_v4  }
  0x70   :  { %437 = vst.msk [vmem:[%s1093_s1 + $0x5] ss:$16 sm:$0x30] %vm3_vm0, %v121_v4  }
  0x71   :  { %438 = vst.msk [vmem:[%s1093_s1 + $0x5] ss:$16 sm:$0xc0] %vm3_vm0, %v121_v4  }
  0x74   :  { %v46_v5 = vpop.permute.xlu1 %45   ;;  %v21_v6 = vpop.permute.xlu0 %20  }
  0x75   :  { %408 = vst.msk [vmem:[%s1093_s1 + $0x2] ss:$16 sm:$0x3] %vm3_vm0, %v46_v5   ;;  %v159_v7 = vpop.permute.xlu2 %158  }
  0x76   :  { %409 = vst.msk [vmem:[%s1093_s1 + $0x2] ss:$16 sm:$0xc] %vm3_vm0, %v46_v5  }
  0x77   :  { %410 = vst.msk [vmem:[%s1093_s1 + $0x2] ss:$16 sm:$0x30] %vm3_vm0, %v46_v5  }
  0x78   :  { %411 = vst.msk [vmem:[%s1093_s1 + $0x2] ss:$16 sm:$0xc0] %vm3_vm0, %v46_v5  }
  0x79   :  { %399 = vst.msk [vmem:[%s1093_s1 + $0x1] ss:$16 sm:$0x3] %vm3_vm0, %v21_v6  }
  0x7a   :  { %400 = vst.msk [vmem:[%s1093_s1 + $0x1] ss:$16 sm:$0xc] %vm3_vm0, %v21_v6  }
  0x7b   :  { %401 = vst.msk [vmem:[%s1093_s1 + $0x1] ss:$16 sm:$0x30] %vm3_vm0, %v21_v6  }
  0x7c   :  { %402 = vst.msk [vmem:[%s1093_s1 + $0x1] ss:$16 sm:$0xc0] %vm3_vm0, %v21_v6   ;;  %v59_v8 = vpop.permute.xlu1 %58   ;;  %v34_v9 = vpop.permute.xlu0 %33  }
  0x7d   :  { %413 = vst.msk [vmem:[%s1093_s1 + $0x82] ss:$16 sm:$0x3] %vm3_vm0, %v59_v8   ;;  %v196_v10 = vpop.permute.xlu2 %195  }
  0x7e   :  { %414 = vst.msk [vmem:[%s1093_s1 + $0x82] ss:$16 sm:$0xc] %vm3_vm0, %v59_v8  }
  0x7f   :  { %415 = vst.msk [vmem:[%s1093_s1 + $0x82] ss:$16 sm:$0x30] %vm3_vm0, %v59_v8  }
  0x80   :  { %416 = vst.msk [vmem:[%s1093_s1 + $0x82] ss:$16 sm:$0xc0] %vm3_vm0, %v59_v8  }
  0x81   :  { %404 = vst.msk [vmem:[%s1093_s1 + $0x81] ss:$16 sm:$0x3] %vm3_vm0, %v34_v9  }
  0x82   :  { %405 = vst.msk [vmem:[%s1093_s1 + $0x81] ss:$16 sm:$0xc] %vm3_vm0, %v34_v9  }
  0x83   :  { %406 = vst.msk [vmem:[%s1093_s1 + $0x81] ss:$16 sm:$0x30] %vm3_vm0, %v34_v9  }
  0x84   :  { %407 = vst.msk [vmem:[%s1093_s1 + $0x81] ss:$16 sm:$0xc0] %vm3_vm0, %v34_v9   ;;  %v109_v11 = vpop.permute.xlu1 %108   ;;  %v96_v12 = vpop.permute.xlu0 %95  }
  0x85   :  { %431 = vst.msk [vmem:[%s1093_s1 + $0x84] ss:$16 sm:$0x3] %vm3_vm0, %v109_v11   ;;  %v234_v13 = vpop.permute.xlu2 %233  }
  0x86   :  { %432 = vst.msk [vmem:[%s1093_s1 + $0x84] ss:$16 sm:$0xc] %vm3_vm0, %v109_v11  }
  0x87   :  { %433 = vst.msk [vmem:[%s1093_s1 + $0x84] ss:$16 sm:$0x30] %vm3_vm0, %v109_v11  }
  0x88   :  { %434 = vst.msk [vmem:[%s1093_s1 + $0x84] ss:$16 sm:$0xc0] %vm3_vm0, %v109_v11  }
  0x89   :  { %426 = vst.msk [vmem:[%s1093_s1 + $0x4] ss:$16 sm:$0x3] %vm3_vm0, %v96_v12  }
  0x8a   :  { %427 = vst.msk [vmem:[%s1093_s1 + $0x4] ss:$16 sm:$0xc] %vm3_vm0, %v96_v12  }
  0x8b   :  { %428 = vst.msk [vmem:[%s1093_s1 + $0x4] ss:$16 sm:$0x30] %vm3_vm0, %v96_v12  }
  0x8c   :  { %429 = vst.msk [vmem:[%s1093_s1 + $0x4] ss:$16 sm:$0xc0] %vm3_vm0, %v96_v12   ;;  %v146_v14 = vpop.permute.xlu1 %145   ;;  %v134_v15 = vpop.permute.xlu0 %133  }
  0x8d   :  { %449 = vst.msk [vmem:[%s1093_s1 + $0x86] ss:$16 sm:$0x3] %vm3_vm0, %v159_v7   ;;  %v271_v16 = vpop.permute.xlu2 %270  }
  0x8e   :  { %450 = vst.msk [vmem:[%s1093_s1 + $0x86] ss:$16 sm:$0xc] %vm3_vm0, %v159_v7  }
  0x8f   :  { %451 = vst.msk [vmem:[%s1093_s1 + $0x86] ss:$16 sm:$0x30] %vm3_vm0, %v159_v7  }
  0x90   :  { %452 = vst.msk [vmem:[%s1093_s1 + $0x86] ss:$16 sm:$0xc0] %vm3_vm0, %v159_v7  }
  0x91   :  { %444 = vst.msk [vmem:[%s1093_s1 + $0x6] ss:$16 sm:$0x3] %vm3_vm0, %v146_v14  }
  0x92   :  { %445 = vst.msk [vmem:[%s1093_s1 + $0x6] ss:$16 sm:$0xc] %vm3_vm0, %v146_v14  }
  0x93   :  { %446 = vst.msk [vmem:[%s1093_s1 + $0x6] ss:$16 sm:$0x30] %vm3_vm0, %v146_v14  }
  0x94   :  { %447 = vst.msk [vmem:[%s1093_s1 + $0x6] ss:$16 sm:$0xc0] %vm3_vm0, %v146_v14   ;;  %v184_v17 = vpop.permute.xlu1 %183   ;;  %v171_v18 = vpop.permute.xlu0 %170  }
  0x95   :  { %440 = vst.msk [vmem:[%s1093_s1 + $0x85] ss:$16 sm:$0x3] %vm3_vm0, %v134_v15   ;;  %v309_v21 = vpop.permute.xlu2 %308  }
  0x96   :  { %441 = vst.msk [vmem:[%s1093_s1 + $0x85] ss:$16 sm:$0xc] %vm3_vm0, %v134_v15  }
  0x97   :  { %442 = vst.msk [vmem:[%s1093_s1 + $0x85] ss:$16 sm:$0x30] %vm3_vm0, %v134_v15  }
  0x98   :  { %443 = vst.msk [vmem:[%s1093_s1 + $0x85] ss:$16 sm:$0xc0] %vm3_vm0, %v134_v15  }
  0x99   :  { %462 = vst.msk [vmem:[%s1093_s1 + $0x8] ss:$16 sm:$0x3] %vm3_vm0, %v196_v10  }
  0x9a   :  { %463 = vst.msk [vmem:[%s1093_s1 + $0x8] ss:$16 sm:$0xc] %vm3_vm0, %v196_v10  }
  0x9b   :  { %464 = vst.msk [vmem:[%s1093_s1 + $0x8] ss:$16 sm:$0x30] %vm3_vm0, %v196_v10  }
  0x9c   :  { %465 = vst.msk [vmem:[%s1093_s1 + $0x8] ss:$16 sm:$0xc0] %vm3_vm0, %v196_v10   ;;  %v221_v19 = vpop.permute.xlu1 %220   ;;  %v209_v20 = vpop.permute.xlu0 %208  }
  0x9d   :  { %458 = vst.msk [vmem:[%s1093_s1 + $0x87] ss:$16 sm:$0x3] %vm3_vm0, %v184_v17   ;;  %v346_v24 = vpop.permute.xlu2 %345  }
  0x9e   :  { %459 = vst.msk [vmem:[%s1093_s1 + $0x87] ss:$16 sm:$0xc] %vm3_vm0, %v184_v17  }
  0x9f   :  { %460 = vst.msk [vmem:[%s1093_s1 + $0x87] ss:$16 sm:$0x30] %vm3_vm0, %v184_v17  }
  0xa0   :  { %461 = vst.msk [vmem:[%s1093_s1 + $0x87] ss:$16 sm:$0xc0] %vm3_vm0, %v184_v17  }
  0xa1   :  { %453 = vst.msk [vmem:[%s1093_s1 + $0x7] ss:$16 sm:$0x3] %vm3_vm0, %v171_v18  }
  0xa2   :  { %454 = vst.msk [vmem:[%s1093_s1 + $0x7] ss:$16 sm:$0xc] %vm3_vm0, %v171_v18  }
  0xa3   :  { %455 = vst.msk [vmem:[%s1093_s1 + $0x7] ss:$16 sm:$0x30] %vm3_vm0, %v171_v18  }
  0xa4   :  { %456 = vst.msk [vmem:[%s1093_s1 + $0x7] ss:$16 sm:$0xc0] %vm3_vm0, %v171_v18   ;;  %v259_v22 = vpop.permute.xlu1 %258   ;;  %v246_v23 = vpop.permute.xlu0 %245  }
  0xa5   :  { %476 = vst.msk [vmem:[%s1093_s1 + $0x89] ss:$16 sm:$0x3] %vm3_vm0, %v234_v13   ;;  %v384_v29 = vpop.permute.xlu2 %383  }
  0xa6   :  { %477 = vst.msk [vmem:[%s1093_s1 + $0x89] ss:$16 sm:$0xc] %vm3_vm0, %v234_v13  }
  0xa7   :  { %478 = vst.msk [vmem:[%s1093_s1 + $0x89] ss:$16 sm:$0x30] %vm3_vm0, %v234_v13  }
  0xa8   :  { %479 = vst.msk [vmem:[%s1093_s1 + $0x89] ss:$16 sm:$0xc0] %vm3_vm0, %v234_v13  }
  0xa9   :  { %471 = vst.msk [vmem:[%s1093_s1 + $0x9] ss:$16 sm:$0x3] %vm3_vm0, %v221_v19  }
  0xaa   :  { %472 = vst.msk [vmem:[%s1093_s1 + $0x9] ss:$16 sm:$0xc] %vm3_vm0, %v221_v19  }
  0xab   :  { %473 = vst.msk [vmem:[%s1093_s1 + $0x9] ss:$16 sm:$0x30] %vm3_vm0, %v221_v19  }
  0xac   :  { %474 = vst.msk [vmem:[%s1093_s1 + $0x9] ss:$16 sm:$0xc0] %vm3_vm0, %v221_v19   ;;  %v296_v25 = vpop.permute.xlu1 %295   ;;  %v284_v26 = vpop.permute.xlu0 %283  }
  0xad   :  { %467 = vst.msk [vmem:[%s1093_s1 + $0x88] ss:$16 sm:$0x3] %vm3_vm0, %v209_v20  }
  0xae   :  { %468 = vst.msk [vmem:[%s1093_s1 + $0x88] ss:$16 sm:$0xc] %vm3_vm0, %v209_v20  }
  0xaf   :  { %469 = vst.msk [vmem:[%s1093_s1 + $0x88] ss:$16 sm:$0x30] %vm3_vm0, %v209_v20  }
  0xb0   :  { %470 = vst.msk [vmem:[%s1093_s1 + $0x88] ss:$16 sm:$0xc0] %vm3_vm0, %v209_v20  }
  0xb1   :  { %489 = vst.msk [vmem:[%s1093_s1 + $0xb] ss:$16 sm:$0x3] %vm3_vm0, %v271_v16  }
  0xb2   :  { %490 = vst.msk [vmem:[%s1093_s1 + $0xb] ss:$16 sm:$0xc] %vm3_vm0, %v271_v16  }
  0xb3   :  { %491 = vst.msk [vmem:[%s1093_s1 + $0xb] ss:$16 sm:$0x30] %vm3_vm0, %v271_v16  }
  0xb4   :  { %492 = vst.msk [vmem:[%s1093_s1 + $0xb] ss:$16 sm:$0xc0] %vm3_vm0, %v271_v16   ;;  %v334_v27 = vpop.permute.xlu1 %333   ;;  %v321_v28 = vpop.permute.xlu0 %320  }
  0xb5   :  { %485 = vst.msk [vmem:[%s1093_s1 + $0x8a] ss:$16 sm:$0x3] %vm3_vm0, %v259_v22  }
  0xb6   :  { %486 = vst.msk [vmem:[%s1093_s1 + $0x8a] ss:$16 sm:$0xc] %vm3_vm0, %v259_v22  }
  0xb7   :  { %487 = vst.msk [vmem:[%s1093_s1 + $0x8a] ss:$16 sm:$0x30] %vm3_vm0, %v259_v22  }
  0xb8   :  { %488 = vst.msk [vmem:[%s1093_s1 + $0x8a] ss:$16 sm:$0xc0] %vm3_vm0, %v259_v22  }
  0xb9   :  { %480 = vst.msk [vmem:[%s1093_s1 + $0xa] ss:$16 sm:$0x3] %vm3_vm0, %v246_v23  }
  0xba   :  { %481 = vst.msk [vmem:[%s1093_s1 + $0xa] ss:$16 sm:$0xc] %vm3_vm0, %v246_v23  }
  0xbb   :  { %482 = vst.msk [vmem:[%s1093_s1 + $0xa] ss:$16 sm:$0x30] %vm3_vm0, %v246_v23  }
  0xbc   :  { %483 = vst.msk [vmem:[%s1093_s1 + $0xa] ss:$16 sm:$0xc0] %vm3_vm0, %v246_v23   ;;  %v371_v30 = vpop.permute.xlu1 %370   ;;  %v359_v31 = vpop.permute.xlu0 %358  }
  0xbd   :  { %503 = vst.msk [vmem:[%s1093_s1 + $0x8c] ss:$16 sm:$0x3] %vm3_vm0, %v309_v21  }
  0xbe   :  { %504 = vst.msk [vmem:[%s1093_s1 + $0x8c] ss:$16 sm:$0xc] %vm3_vm0, %v309_v21  }
  0xbf   :  { %505 = vst.msk [vmem:[%s1093_s1 + $0x8c] ss:$16 sm:$0x30] %vm3_vm0, %v309_v21  }
  0xc0   :  { %506 = vst.msk [vmem:[%s1093_s1 + $0x8c] ss:$16 sm:$0xc0] %vm3_vm0, %v309_v21  }
  0xc1   :  { %498 = vst.msk [vmem:[%s1093_s1 + $0xc] ss:$16 sm:$0x3] %vm3_vm0, %v296_v25  }
  0xc2   :  { %499 = vst.msk [vmem:[%s1093_s1 + $0xc] ss:$16 sm:$0xc] %vm3_vm0, %v296_v25  }
  0xc3   :  { %500 = vst.msk [vmem:[%s1093_s1 + $0xc] ss:$16 sm:$0x30] %vm3_vm0, %v296_v25  }
  0xc4   :  { %501 = vst.msk [vmem:[%s1093_s1 + $0xc] ss:$16 sm:$0xc0] %vm3_vm0, %v296_v25  }
  0xc5   :  { %494 = vst.msk [vmem:[%s1093_s1 + $0x8b] ss:$16 sm:$0x3] %vm3_vm0, %v284_v26  }
  0xc6   :  { %495 = vst.msk [vmem:[%s1093_s1 + $0x8b] ss:$16 sm:$0xc] %vm3_vm0, %v284_v26  }
  0xc7   :  { %496 = vst.msk [vmem:[%s1093_s1 + $0x8b] ss:$16 sm:$0x30] %vm3_vm0, %v284_v26  }
  0xc8   :  { %497 = vst.msk [vmem:[%s1093_s1 + $0x8b] ss:$16 sm:$0xc0] %vm3_vm0, %v284_v26  }
  0xc9   :  { %516 = vst.msk [vmem:[%s1093_s1 + $0xe] ss:$16 sm:$0x3] %vm3_vm0, %v346_v24  }
  0xca   :  { %517 = vst.msk [vmem:[%s1093_s1 + $0xe] ss:$16 sm:$0xc] %vm3_vm0, %v346_v24  }
  0xcb   :  { %518 = vst.msk [vmem:[%s1093_s1 + $0xe] ss:$16 sm:$0x30] %vm3_vm0, %v346_v24  }
  0xcc   :  { %519 = vst.msk [vmem:[%s1093_s1 + $0xe] ss:$16 sm:$0xc0] %vm3_vm0, %v346_v24  }
  0xcd   :  { %512 = vst.msk [vmem:[%s1093_s1 + $0x8d] ss:$16 sm:$0x3] %vm3_vm0, %v334_v27  }
  0xce   :  { %513 = vst.msk [vmem:[%s1093_s1 + $0x8d] ss:$16 sm:$0xc] %vm3_vm0, %v334_v27  }
  0xcf   :  { %514 = vst.msk [vmem:[%s1093_s1 + $0x8d] ss:$16 sm:$0x30] %vm3_vm0, %v334_v27  }
  0xd0   :  { %515 = vst.msk [vmem:[%s1093_s1 + $0x8d] ss:$16 sm:$0xc0] %vm3_vm0, %v334_v27  }
  0xd1   :  { %507 = vst.msk [vmem:[%s1093_s1 + $0xd] ss:$16 sm:$0x3] %vm3_vm0, %v321_v28  }
  0xd2   :  { %508 = vst.msk [vmem:[%s1093_s1 + $0xd] ss:$16 sm:$0xc] %vm3_vm0, %v321_v28  }
  0xd3   :  { %509 = vst.msk [vmem:[%s1093_s1 + $0xd] ss:$16 sm:$0x30] %vm3_vm0, %v321_v28  }
  0xd4   :  { %510 = vst.msk [vmem:[%s1093_s1 + $0xd] ss:$16 sm:$0xc0] %vm3_vm0, %v321_v28  }
  0xd5   :  { %530 = vst.msk [vmem:[%s1093_s1 + $0x8f] ss:$16 sm:$0x3] %vm3_vm0, %v384_v29  }
  0xd6   :  { %531 = vst.msk [vmem:[%s1093_s1 + $0x8f] ss:$16 sm:$0xc] %vm3_vm0, %v384_v29  }
  0xd7   :  { %532 = vst.msk [vmem:[%s1093_s1 + $0x8f] ss:$16 sm:$0x30] %vm3_vm0, %v384_v29  }
  0xd8   :  { %533 = vst.msk [vmem:[%s1093_s1 + $0x8f] ss:$16 sm:$0xc0] %vm3_vm0, %v384_v29  }
  0xd9   :  { %525 = vst.msk [vmem:[%s1093_s1 + $0xf] ss:$16 sm:$0x3] %vm3_vm0, %v371_v30  }
  0xda   :  { %526 = vst.msk [vmem:[%s1093_s1 + $0xf] ss:$16 sm:$0xc] %vm3_vm0, %v371_v30  }
  0xdb   :  { %527 = vst.msk [vmem:[%s1093_s1 + $0xf] ss:$16 sm:$0x30] %vm3_vm0, %v371_v30  }
  0xdc   :  { %528 = vst.msk [vmem:[%s1093_s1 + $0xf] ss:$16 sm:$0xc0] %vm3_vm0, %v371_v30  }
  0xdd   :  { %521 = vst.msk [vmem:[%s1093_s1 + $0x8e] ss:$16 sm:$0x3] %vm3_vm0, %v359_v31  }
  0xde   :  { %522 = vst.msk [vmem:[%s1093_s1 + $0x8e] ss:$16 sm:$0xc] %vm3_vm0, %v359_v31  }
  0xdf   :  { %523 = vst.msk [vmem:[%s1093_s1 + $0x8e] ss:$16 sm:$0x30] %vm3_vm0, %v359_v31  }
  0xe0   :  { %524 = vst.msk [vmem:[%s1093_s1 + $0x8e] ss:$16 sm:$0xc0] %vm3_vm0, %v359_v31  }

// kernel: conv_bn.3
= control target key start
LH: loop header
LB: loop body
LE: loop exit
PB: predicated region body
PF: predicated region fallthrough
CT: control target
= control target key end

     0   :  { %s829_s12 = smov 0   ;;  %s831_s13 = smov 0   ;;  %s987_s0 = inlined_call_operand.vmem [shape: bf16[2,256,128], index: 0, kind: input, shape index: {}, may-alias: {0,3}]   ;;  %s988_s1 = inlined_call_operand.vmem [shape: f32[1,1,128], index: 1, kind: input, shape index: {}]   ;;  %s989_s2 = inlined_call_operand.vmem [shape: f32[1,1,128], index: 2, kind: input, shape index: {}]   ;;  %s990_s3 = inlined_call_operand.vmem [shape: bf16[2,256,128], index: 3, kind: output, shape index: {}, may-alias: {0,3}]  }
   0x1   :  { %s833_s14 = smov 0  }
   0x2 LB: > { %s25_s15 = sadd.s32 1, %s803_s13  ;;  %p576_p0 = scmp.ge.s32.totalorder %s807_s14, 1  ;;  %s807_s14 = sphi %s833_s14, %s13_s14   ;;  %s803_s13 = sphi %s831_s13, %s992_s13   ;;  %s799_s12 = sphi %s829_s12, %s991_s12  }
   0x3   : > { %p27_p1 = scmp.ge.s32.totalorder %s25_s15, 2  ;;  %p172_p2 = scmp.lt.s32.totalorder %s807_s14, 3 }
   0x5   : > { %s994_s15 = smov (%p27_p1, %s25_s15), 0  ;;  %p173_p3 = pnand %p576_p0, %p172_p2 }
   0x6   : > { %p208_p4 = scmp.lt.s32.totalorder (!%p173_p3), %s799_s12, 1 }
   0x7   : > { %176 = sbr.rel (%p173_p3) target bundleno = 56 (0x38), region = 32 }
   0xc   : > { %s996_s12 = smov (!%p208_p4, %s799_s12), 1  ;;  %v783_v36 = vld [vmem:[%s988_s1] ss:$0 sm:$0xff] }
   0xd   : > { %s583_s16 = sshll.u32 %s996_s12, 7 }
   0xe   : > { %s855_s19 = scalar_lea.vmem %s987_s0, %s583_s16  ;;  %s922_s26 = scalar_lea.vmem %s990_s3, %s583_s16 }
   0xf   : > { %v586_v0 = vld [vmem:[%s855_s19] sm:$0xff]   ;;  %v729_v1 = vld [vmem:[%s855_s19 + $0x8] sm:$0xff]   ;;  %v730_v2 = vld [vmem:[%s855_s19 + $0x10] sm:$0xff]  }
  0x10   : > { %v587_v3 = vunpack.c.l.bf16 %v586_v0  ;;  %v588_v4 = vunpack.c.h.bf16 %v586_v0  ;;  %v591_v5 = vunpack.c.l.bf16 %v729_v1  ;;  %v592_v6 = vunpack.c.h.bf16 %v729_v1  ;;  %v731_v7 = vld [vmem:[%s855_s19 + $0x18] sm:$0xff]   ;;  %v732_v8 = vld [vmem:[%s855_s19 + $0x20] sm:$0xff]   ;;  %v733_v9 = vld [vmem:[%s855_s19 + $0x28] sm:$0xff]  }
  0x11   : > { %v595_v10 = vunpack.c.l.bf16 %v730_v2  ;;  %v596_v11 = vunpack.c.h.bf16 %v730_v2  ;;  %v599_v12 = vunpack.c.l.bf16 %v731_v7  ;;  %v600_v13 = vunpack.c.h.bf16 %v731_v7  ;;  %v734_v14 = vld [vmem:[%s855_s19 + $0x30] sm:$0xff]   ;;  %v735_v15 = vld [vmem:[%s855_s19 + $0x38] sm:$0xff]   ;;  %v736_v16 = vld [vmem:[%s855_s19 + $0x40] sm:$0xff]  }
  0x12   : > { %v603_v17 = vunpack.c.l.bf16 %v732_v8  ;;  %v604_v18 = vunpack.c.h.bf16 %v732_v8  ;;  %v607_v19 = vunpack.c.l.bf16 %v733_v9  ;;  %v608_v20 = vunpack.c.h.bf16 %v733_v9  ;;  %v737_v21 = vld [vmem:[%s855_s19 + $0x48] sm:$0xff]   ;;  %v738_v22 = vld [vmem:[%s855_s19 + $0x50] sm:$0xff]   ;;  %v739_v23 = vld [vmem:[%s855_s19 + $0x58] sm:$0xff]  }
  0x13   : > { %v611_v24 = vunpack.c.l.bf16 %v734_v14  ;;  %v612_v25 = vunpack.c.h.bf16 %v734_v14  ;;  %v615_v26 = vunpack.c.l.bf16 %v735_v15  ;;  %v616_v27 = vunpack.c.h.bf16 %v735_v15  ;;  %v740_v28 = vld [vmem:[%s855_s19 + $0x60] sm:$0xff]   ;;  %v741_v29 = vld [vmem:[%s855_s19 + $0x68] sm:$0xff]   ;;  %v742_v34 = vld [vmem:[%s855_s19 + $0x70] sm:$0xff]  }
  0x14   : > { %v619_v30 = vunpack.c.l.bf16 %v736_v16  ;;  %v620_v31 = vunpack.c.h.bf16 %v736_v16  ;;  %v623_v32 = vunpack.c.l.bf16 %v737_v21  ;;  %v624_v33 = vunpack.c.h.bf16 %v737_v21  ;;  %v743_v35 = vld [vmem:[%s855_s19 + $0x78] sm:$0xff]  }
  0x15   : > { %v627_v37 = vunpack.c.l.bf16 %v738_v22  ;;  %v628_v38 = vunpack.c.h.bf16 %v738_v22  ;;  %v631_v39 = vunpack.c.l.bf16 %v739_v23  ;;  %v632_v40 = vunpack.c.h.bf16 %v739_v23 }
  0x16   : > { %v635_v41 = vunpack.c.l.bf16 %v740_v28  ;;  %v636_v42 = vunpack.c.h.bf16 %v740_v28  ;;  %v639_v43 = vunpack.c.l.bf16 %v741_v29  ;;  %v640_v44 = vunpack.c.h.bf16 %v741_v29 }
  0x17   : > { %v643_v45 = vunpack.c.l.bf16 %v742_v34  ;;  %v644_v46 = vunpack.c.h.bf16 %v742_v34  ;;  %v647_v47 = vunpack.c.l.bf16 %v743_v35  ;;  %v648_v48 = vunpack.c.h.bf16 %v743_v35 }
  0x18   : > { %v298_v49 = vmul.f32 %v783_v36, %v587_v3  ;;  %v299_v50 = vmul.f32 %v783_v36, %v588_v4  ;;  %v300_v51 = vmul.f32 %v783_v36, %v591_v5  ;;  %v301_v52 = vmul.f32 %v783_v36, %v592_v6  ;;  %v883_v4 = vld [vmem:[%s989_s2] ss:$0 sm:$0xff] }
  0x19   : > { %v302_v53 = vmul.f32 %v783_v36, %v595_v10  ;;  %v303_v54 = vmul.f32 %v783_v36, %v596_v11  ;;  %v304_v55 = vmul.f32 %v783_v36, %v599_v12  ;;  %v305_v56 = vmul.f32 %v783_v36, %v600_v13 }
  0x1a   : > { %v306_v57 = vmul.f32 %v783_v36, %v603_v17  ;;  %v307_v58 = vmul.f32 %v783_v36, %v604_v18  ;;  %v308_v59 = vmul.f32 %v783_v36, %v607_v19  ;;  %v309_v60 = vmul.f32 %v783_v36, %v608_v20 }
  0x1b   : > { %v310_v61 = vmul.f32 %v783_v36, %v611_v24  ;;  %v311_v62 = vmul.f32 %v783_v36, %v612_v25  ;;  %v312_v63 = vmul.f32 %v783_v36, %v615_v26  ;;  %v313_v0 = vmul.f32 %v783_v36, %v616_v27 }
  0x1c   : > { %v314_v1 = vmul.f32 %v783_v36, %v619_v30  ;;  %v315_v2 = vmul.f32 %v783_v36, %v620_v31  ;;  %v876_v7 = vmul.f32 %v783_v36, %v623_v32  ;;  %v878_v3 = vmul.f32 %v783_v36, %v624_v33 }
  0x1d   : > { %v885_v5 = vmul.f32 %v783_v36, %v627_v37  ;;  %v887_v6 = vmul.f32 %v783_v36, %v628_v38  ;;  %v889_v8 = vmul.f32 %v783_v36, %v631_v39  ;;  %v891_v9 = vmul.f32 %v783_v36, %v632_v40 }
  0x1e   : > { %v893_v10 = vmul.f32 %v783_v36, %v635_v41  ;;  %v895_v11 = vmul.f32 %v783_v36, %v636_v42  ;;  %v897_v12 = vmul.f32 %v783_v36, %v639_v43  ;;  %v899_v13 = vmul.f32 %v783_v36, %v640_v44 }
  0x1f   : > { %v901_v14 = vmul.f32 %v783_v36, %v643_v45  ;;  %v903_v15 = vmul.f32 %v783_v36, %v644_v46  ;;  %v905_v16 = vmul.f32 %v783_v36, %v647_v47  ;;  %v907_v17 = vmul.f32 %v783_v36, %v648_v48 }
  0x20   : > { %v334_v18 = vadd.f32 %v883_v4, %v298_v49  ;;  %v335_v19 = vadd.f32 %v883_v4, %v299_v50  ;;  %v336_v20 = vadd.f32 %v883_v4, %v300_v51  ;;  %v337_v21 = vadd.f32 %v883_v4, %v301_v52 }
  0x21   : > { %v338_v22 = vadd.f32 %v883_v4, %v302_v53  ;;  %v339_v23 = vadd.f32 %v883_v4, %v303_v54  ;;  %v340_v24 = vadd.f32 %v883_v4, %v304_v55  ;;  %v341_v25 = vadd.f32 %v883_v4, %v305_v56 }
  0x22   : > { %v366_v26 = vmax.f32 %v334_v18, 0.0  ;;  %v367_v27 = vmax.f32 %v335_v19, 0.0  ;;  %v368_v28 = vmax.f32 %v336_v20, 0.0  ;;  %v369_v29 = vmax.f32 %v337_v21, 0.0 }
  0x23   : > { %v370_v30 = vmax.f32 %v338_v22, 0.0  ;;  %v371_v31 = vmax.f32 %v339_v23, 0.0  ;;  %v372_v32 = vmax.f32 %v340_v24, 0.0  ;;  %v373_v33 = vmax.f32 %v341_v25, 0.0 }
  0x24   : > { %v652_v34 = vpack.c.bf16 %v367_v27, %v366_v26  ;;  %v657_v35 = vpack.c.bf16 %v369_v29, %v368_v28  ;;  %v342_v36 = vadd.f32 %v883_v4, %v306_v57  ;;  %v343_v37 = vadd.f32 %v883_v4, %v307_v58 }
  0x25   : > { %v662_v38 = vpack.c.bf16 %v371_v31, %v370_v30  ;;  %v667_v39 = vpack.c.bf16 %v373_v33, %v372_v32  ;;  %v344_v40 = vadd.f32 %v883_v4, %v308_v59  ;;  %v345_v41 = vadd.f32 %v883_v4, %v309_v60 }
  0x26   : > { %653 = vst [vmem:[%s922_s26] sm:$0xff] %v652_v34   ;;  %v374_v42 = vmax.f32 %v342_v36, 0.0  ;;  %v375_v43 = vmax.f32 %v343_v37, 0.0  ;;  %v346_v44 = vadd.f32 %v883_v4, %v310_v61  ;;  %v347_v45 = vadd.f32 %v883_v4, %v311_v62 }
  0x27   : > { %744 = vst [vmem:[%s922_s26 + $0x8] sm:$0xff] %v657_v35   ;;  %v376_v46 = vmax.f32 %v344_v40, 0.0  ;;  %v377_v47 = vmax.f32 %v345_v41, 0.0  ;;  %v348_v48 = vadd.f32 %v883_v4, %v312_v63  ;;  %v349_v49 = vadd.f32 %v883_v4, %v313_v0 }
  0x28   : > { %745 = vst [vmem:[%s922_s26 + $0x10] sm:$0xff] %v662_v38   ;;  %v672_v50 = vpack.c.bf16 %v375_v43, %v374_v42  ;;  %v378_v51 = vmax.f32 %v346_v44, 0.0  ;;  %v379_v52 = vmax.f32 %v347_v45, 0.0  ;;  %v350_v53 = vadd.f32 %v883_v4, %v314_v1 }
  0x29   : > { %746 = vst [vmem:[%s922_s26 + $0x18] sm:$0xff] %v667_v39   ;;  %v677_v54 = vpack.c.bf16 %v377_v47, %v376_v46  ;;  %v380_v55 = vmax.f32 %v348_v48, 0.0  ;;  %v381_v56 = vmax.f32 %v349_v49, 0.0  ;;  %v351_v57 = vadd.f32 %v883_v4, %v315_v2 }
  0x2a   : > { %747 = vst [vmem:[%s922_s26 + $0x20] sm:$0xff] %v672_v50   ;;  %v682_v58 = vpack.c.bf16 %v379_v52, %v378_v51  ;;  %v382_v59 = vmax.f32 %v350_v53, 0.0  ;;  %v352_v60 = vadd.f32 %v883_v4, %v876_v7  ;;  %v353_v61 = vadd.f32 %v883_v4, %v878_v3 }
  0x2b   : > { %748 = vst [vmem:[%s922_s26 + $0x28] sm:$0xff] %v677_v54   ;;  %v687_v62 = vpack.c.bf16 %v381_v56, %v380_v55  ;;  %v383_v63 = vmax.f32 %v351_v57, 0.0  ;;  %v354_v0 = vadd.f32 %v883_v4, %v885_v5  ;;  %v355_v1 = vadd.f32 %v883_v4, %v887_v6 }
  0x2c   : > { %749 = vst [vmem:[%s922_s26 + $0x30] sm:$0xff] %v682_v58   ;;  %v384_v2 = vmax.f32 %v352_v60, 0.0  ;;  %v385_v18 = vmax.f32 %v353_v61, 0.0  ;;  %v356_v19 = vadd.f32 %v883_v4, %v889_v8  ;;  %v357_v7 = vadd.f32 %v883_v4, %v891_v9 }
  0x2d   : > { %750 = vst [vmem:[%s922_s26 + $0x38] sm:$0xff] %v687_v62   ;;  %v692_v3 = vpack.c.bf16 %v383_v63, %v382_v59  ;;  %v386_v20 = vmax.f32 %v354_v0, 0.0  ;;  %v387_v21 = vmax.f32 %v355_v1, 0.0  ;;  %v358_v5 = vadd.f32 %v883_v4, %v893_v10 }
  0x2e   : > { %v697_v22 = vpack.c.bf16 %v385_v18, %v384_v2  ;;  %v388_v6 = vmax.f32 %v356_v19, 0.0  ;;  %v389_v23 = vmax.f32 %v357_v7, 0.0  ;;  %v359_v24 = vadd.f32 %v883_v4, %v895_v11 }
  0x2f   : > { %751 = vst [vmem:[%s922_s26 + $0x40] sm:$0xff] %v692_v3   ;;  %v702_v8 = vpack.c.bf16 %v387_v21, %v386_v20  ;;  %v390_v25 = vmax.f32 %v358_v5, 0.0  ;;  %v360_v9 = vadd.f32 %v883_v4, %v897_v12  ;;  %v361_v26 = vadd.f32 %v883_v4, %v899_v13 }
  0x30   : > { %752 = vst [vmem:[%s922_s26 + $0x48] sm:$0xff] %v697_v22   ;;  %v707_v27 = vpack.c.bf16 %v389_v23, %v388_v6  ;;  %v391_v10 = vmax.f32 %v359_v24, 0.0  ;;  %v362_v28 = vadd.f32 %v883_v4, %v901_v14  ;;  %v363_v11 = vadd.f32 %v883_v4, %v903_v15 }
  0x31   : > { %753 = vst [vmem:[%s922_s26 + $0x50] sm:$0xff] %v702_v8   ;;  %v392_v29 = vmax.f32 %v360_v9, 0.0  ;;  %v393_v30 = vmax.f32 %v361_v26, 0.0  ;;  %v364_v12 = vadd.f32 %v883_v4, %v905_v16  ;;  %v365_v13 = vadd.f32 %v883_v4, %v907_v17 }
  0x32   : > { %754 = vst [vmem:[%s922_s26 + $0x58] sm:$0xff] %v707_v27   ;;  %v712_v31 = vpack.c.bf16 %v391_v10, %v390_v25  ;;  %v394_v32 = vmax.f32 %v362_v28, 0.0  ;;  %v395_v33 = vmax.f32 %v363_v11, 0.0 }
  0x33   : > { %v717_v14 = vpack.c.bf16 %v393_v30, %v392_v29  ;;  %v396_v34 = vmax.f32 %v364_v12, 0.0  ;;  %v397_v35 = vmax.f32 %v365_v13, 0.0 }
  0x34   : > { %755 = vst [vmem:[%s922_s26 + $0x60] sm:$0xff] %v712_v31   ;;  %v722_v15 = vpack.c.bf16 %v395_v33, %v394_v32 }
  0x35   : > { %756 = vst [vmem:[%s922_s26 + $0x68] sm:$0xff] %v717_v14   ;;  %v727_v36 = vpack.c.bf16 %v397_v35, %v396_v34 }
  0x36   : > { %757 = vst [vmem:[%s922_s26 + $0x70] sm:$0xff] %v722_v15  }
  0x37   : > { %758 = vst [vmem:[%s922_s26 + $0x78] sm:$0xff] %v727_v36  }
  0x38 PF: > { %s13_s14 = sadd.s32 1, %s807_s14   ;;  %s991_s12 = smov %s803_s13 }
  0x39   : > { %p10_p5 = scmp.ge.s32.totalorder %s13_s14, 4   ;;  %s992_s13 = smov %s994_s15 }
  0x3b   :  { %12 = sbr.rel (!%p10_p5) target bundleno = 2 (0x2), region = 68 }

// kernel: conv_bn.2
= control target key start
LH: loop header
LB: loop body
LE: loop exit
PB: predicated region body
PF: predicated region fallthrough
CT: control target
= control target key end

     0   :  { %s1419_s18 = smov 0   ;;  %s1421_s19 = smov 0   ;;  %s1765_s0 = inlined_call_operand.vmem [shape: bf16[2,256,4], index: 0, kind: input, shape index: {}]   ;;  %s1766_s1 = inlined_call_operand.vmem [shape: bf16[1,4,128], index: 1, kind: input, shape index: {}]   ;;  %s1767_s2 = inlined_call_operand.vmem [shape: f32[256,1], index: 2, kind: input, shape index: {}]   ;;  %s1768_s3 = inlined_call_operand.vmem [shape: bf16[2,256,128], index: 3, kind: output, shape index: {0}]   ;;  %s1769_s4 = inlined_call_operand.vmem [shape: f32[16,128], index: 4, kind: output, shape index: {1}]   ;;  %s1770_s5 = inlined_call_operand.vmem [shape: f32[16,128], index: 5, kind: output, shape index: {2}]  }
   0x1   :  { %s1423_s20 = smov 0  }
   0x2 LB: > { %s28_s21 = sadd.s32 1, %s1382_s19  ;;  %p1131_p0 = scmp.ge.s32.totalorder %s1386_s20, 1  ;;  %s1386_s20 = sphi %s1423_s20, %s16_s20   ;;  %s1382_s19 = sphi %s1421_s19, %s1772_s19   ;;  %s1378_s18 = sphi %s1419_s18, %s1771_s18  }
   0x3   : > { %p30_p1 = scmp.ge.s32.totalorder %s28_s21, 2  ;;  %p219_p2 = scmp.lt.s32.totalorder %s1386_s20, 3 }
   0x5   : > { %s1774_s21 = smov (%p30_p1, %s28_s21), 0  ;;  %p220_p3 = pnand %p1131_p0, %p219_p2 }
   0x6   : > { %p268_p4 = scmp.lt.s32.totalorder (!%p220_p3), %s1378_s18, 1 }
   0x7   : > { %223 = sbr.rel (%p220_p3) target bundleno = 268 (0x10c), region = 32 }
   0xc   : > { %v623_v0 = vld [vmem:[%s1767_s2 + $0x20] sm:$0xff]  ;;  %v621_v1 = vld [vmem:[%s1767_s2 + $0x10] sm:$0xff]  ;;  %vm462_vm0 = vcmask 1041408   ;;  %v1388_v3 = vmov 0   ;;  %s1776_s18 = smov (!%p268_p4, %s1378_s18), 1  ;;  %vm413_vm1 = vcmask 31744  }
   0xd   : > { %v619_v2 = vld [vmem:[%s1767_s2] sm:$0xff]  ;;  %1363 = vset.pattern.permute.xlu2 %v1388_v3  ;;  %1362 = vset.pattern.permute.xlu1 %v1388_v3  ;;  %s1220_s30 = sshll.u32 %s1776_s18, 7  ;;  %v624_v10 = vld [vmem:[%s1767_s2 + $0x28] sm:$0xff]  ;;  %v622_v11 = vld [vmem:[%s1767_s2 + $0x18] sm:$0xff] }
   0xe   : > { %v332_v4 = vld [vmem:[%s1766_s1] sm:$0x3]  ;;  %1361 = vset.pattern.permute.xlu0 %v1388_v3  ;;  %673 = vperm.xlu2 %1363, %v623_v0   ;;  %s1457_s8 = scalar_lea.vmem %s1765_s0, %s1220_s30  ;;  %v620_v12 = vld [vmem:[%s1767_s2 + $0x8] sm:$0xff]  ;;  %v626_v14 = vld [vmem:[%s1767_s2 + $0x38] sm:$0xff]  ;;  %s1591_s11 = scalar_lea.vmem %s1768_s3, %s1220_s30 }
   0xf   : > { %v464_v5 = vsel %vm462_vm0, %v332_v4, 0  ;;  %663 = vperm.xlu1 %1362, %v621_v1   ;;  %653 = vperm.xlu0 %1361, %v619_v2   ;;  %v1222_v6 = vld [vmem:[%s1457_s8] sm:$0xff]  ;;  %v625_v15 = vld [vmem:[%s1767_s2 + $0x30] sm:$0xff]  ;;  %v1223_v16 = vld [vmem:[%s1457_s8 + $0x8] sm:$0xff]  ;;  %s1136_s30 = sshll.u32 %s1776_s18, 3 }
  0x10   : > { %473 = vmatpush.bf16.msra.mxu0 %v464_v5  ;;  %1333 = vmatpush.bf16.msra.mxu1 %v464_v5  ;;  %v1226_v7 = vld [vmem:[%s1457_s8 + $0x20] sm:$0xff]  ;;  %v1227_v17 = vld [vmem:[%s1457_s8 + $0x28] sm:$0xff]  ;;  %v630_v20 = vld [vmem:[%s1767_s2 + $0x58] sm:$0xff]  ;;  %s291_s13 = scalar_lea.vmem %s1769_s4, %s1136_s30  ;;  %s298_s16 = scalar_lea.vmem %s1770_s5, %s1136_s30 }
  0x11   : > { %1334 = vmatpush.bf16.msra.mxu2 %v464_v5  ;;  %1335 = vmatpush.bf16.msra.mxu3 %v464_v5  ;;  %v1230_v8 = vld [vmem:[%s1457_s8 + $0x40] sm:$0xff]  ;;  %v1231_v18 = vld [vmem:[%s1457_s8 + $0x48] sm:$0xff]  ;;  %v629_v21 = vld [vmem:[%s1767_s2 + $0x50] sm:$0xff] }
  0x12   : > { %v1234_v9 = vld [vmem:[%s1457_s8 + $0x60] sm:$0xff]  ;;  %v1235_v19 = vld [vmem:[%s1457_s8 + $0x68] sm:$0xff]  ;;  %v633_v23 = vld [vmem:[%s1767_s2 + $0x70] sm:$0xff] }
  0x13   : > { %1202 = vmatmul.msk.bf16.vlgmr.msra.gmra.mxu0 %vm413_vm1, %v1222_v6  ;;  %1206 = vmatmul.msk.bf16.vlgmr.msra.gmra.mxu1 %vm413_vm1, %v1226_v7  ;;  %v627_v13 = vld [vmem:[%s1767_s2 + $0x40] sm:$0xff]  ;;  %v628_v22 = vld [vmem:[%s1767_s2 + $0x48] sm:$0xff]  ;;  %v1224_v26 = vld [vmem:[%s1457_s8 + $0x10] sm:$0xff] }
  0x14   : > { %1210 = vmatmul.msk.bf16.vlgmr.msra.gmra.mxu2 %vm413_vm1, %v1230_v8  ;;  %1214 = vmatmul.msk.bf16.vlgmr.msra.gmra.mxu3 %vm413_vm1, %v1234_v9  ;;  %v632_v24 = vld [vmem:[%s1767_s2 + $0x68] sm:$0xff]  ;;  %v631_v25 = vld [vmem:[%s1767_s2 + $0x60] sm:$0xff]  ;;  %v1228_v27 = vld [vmem:[%s1457_s8 + $0x30] sm:$0xff] }
  0x15   : > { %v1232_v28 = vld [vmem:[%s1457_s8 + $0x50] sm:$0xff]  ;;  %v636_v30 = vld [vmem:[%s1767_s2 + $0x88] sm:$0xff]  ;;  %v635_v31 = vld [vmem:[%s1767_s2 + $0x80] sm:$0xff] }
  0x16   : > { %678 = vperm.xlu2 %1363, %v624_v10   ;;  %v1236_v29 = vld [vmem:[%s1457_s8 + $0x70] sm:$0xff]  ;;  %v634_v32 = vld [vmem:[%s1767_s2 + $0x78] sm:$0xff]  ;;  %v639_v33 = vld [vmem:[%s1767_s2 + $0xa0] sm:$0xff] }
  0x17   : > { %668 = vperm.xlu1 %1362, %v622_v11   ;;  %658 = vperm.xlu0 %1361, %v620_v12   ;;  %v638_v34 = vld [vmem:[%s1767_s2 + $0x98] sm:$0xff]  ;;  %v637_v35 = vld [vmem:[%s1767_s2 + $0x90] sm:$0xff]  ;;  %v640_v42 = vld [vmem:[%s1767_s2 + $0xa8] sm:$0xff] }
  0x18   : > { %v1225_v36 = vld [vmem:[%s1457_s8 + $0x18] sm:$0xff]  ;;  %v641_v41 = vld [vmem:[%s1767_s2 + $0xb0] sm:$0xff]  ;;  %v644_v44 = vld [vmem:[%s1767_s2 + $0xc8] sm:$0xff] }
  0x19   : > { %v1229_v37 = vld [vmem:[%s1457_s8 + $0x38] sm:$0xff]  ;;  %v645_v43 = vld [vmem:[%s1767_s2 + $0xd0] sm:$0xff]  ;;  %v643_v45 = vld [vmem:[%s1767_s2 + $0xc0] sm:$0xff] }
  0x1a   : > { %v1233_v38 = vld [vmem:[%s1457_s8 + $0x58] sm:$0xff]  ;;  %v648_v46 = vld [vmem:[%s1767_s2 + $0xe8] sm:$0xff]  ;;  %v647_v47 = vld [vmem:[%s1767_s2 + $0xe0] sm:$0xff] }
  0x1b   : > { %v1237_v39 = vld [vmem:[%s1457_s8 + $0x78] sm:$0xff]  ;;  %v649_v50 = vld [vmem:[%s1767_s2 + $0xf0] sm:$0xff] }
  0x1c   : > { %v642_v40 = vld [vmem:[%s1767_s2 + $0xb8] sm:$0xff] }
  0x1d   : > { %v646_v48 = vld [vmem:[%s1767_s2 + $0xd8] sm:$0xff] }
  0x1e   : > { %693 = vperm.xlu2 %1363, %v627_v13   ;;  %v650_v49 = vld [vmem:[%s1767_s2 + $0xf8] sm:$0xff] }
  0x1f   : > { %688 = vperm.xlu1 %1362, %v626_v14   ;;  %683 = vperm.xlu0 %1361, %v625_v15  }
  0x23   : > { %1203 = vmatmul.msk.bf16.gmra.mxu0 %vm413_vm1, %v1223_v16  ;;  %1207 = vmatmul.msk.bf16.gmra.mxu1 %vm413_vm1, %v1227_v17 }
  0x24   : > { %1211 = vmatmul.msk.bf16.gmra.mxu2 %vm413_vm1, %v1231_v18  ;;  %1215 = vmatmul.msk.bf16.gmra.mxu3 %vm413_vm1, %v1235_v19 }
  0x26   : > { %708 = vperm.xlu2 %1363, %v630_v20  }
  0x27   : > { %703 = vperm.xlu1 %1362, %v629_v21   ;;  %698 = vperm.xlu0 %1361, %v628_v22  }
  0x2e   : > { %723 = vperm.xlu2 %1363, %v633_v23  }
  0x2f   : > { %718 = vperm.xlu1 %1362, %v632_v24   ;;  %713 = vperm.xlu0 %1361, %v631_v25  }
  0x33   : > { %1204 = vmatmul.msk.bf16.gmra.mxu0 %vm413_vm1, %v1224_v26  ;;  %1208 = vmatmul.msk.bf16.gmra.mxu1 %vm413_vm1, %v1228_v27 }
  0x34   : > { %1212 = vmatmul.msk.bf16.gmra.mxu2 %vm413_vm1, %v1232_v28  ;;  %1216 = vmatmul.msk.bf16.gmra.mxu3 %vm413_vm1, %v1236_v29 }
  0x36   : > { %738 = vperm.xlu2 %1363, %v636_v30  }
  0x37   : > { %733 = vperm.xlu1 %1362, %v635_v31   ;;  %728 = vperm.xlu0 %1361, %v634_v32  }
  0x3e   : > { %753 = vperm.xlu2 %1363, %v639_v33  }
  0x3f   : > { %748 = vperm.xlu1 %1362, %v638_v34   ;;  %743 = vperm.xlu0 %1361, %v637_v35  }
  0x43   : > { %1205 = vmatmul.msk.bf16.gmra.mxu0 %vm413_vm1, %v1225_v36  ;;  %1209 = vmatmul.msk.bf16.gmra.mxu1 %vm413_vm1, %v1229_v37 }
  0x44   : > { %1213 = vmatmul.msk.bf16.gmra.mxu2 %vm413_vm1, %v1233_v38  ;;  %1217 = vmatmul.msk.bf16.gmra.mxu3 %vm413_vm1, %v1237_v39 }
  0x46   : > { %768 = vperm.xlu2 %1363, %v642_v40  }
  0x47   : > { %763 = vperm.xlu1 %1362, %v641_v41   ;;  %758 = vperm.xlu0 %1361, %v640_v42  }
  0x4e   : > { %783 = vperm.xlu2 %1363, %v645_v43  }
  0x4f   : > { %778 = vperm.xlu1 %1362, %v644_v44   ;;  %773 = vperm.xlu0 %1361, %v643_v45  }
  0x56   : > { %798 = vperm.xlu2 %1363, %v648_v46  }
  0x57   : > { %793 = vperm.xlu1 %1362, %v647_v47   ;;  %788 = vperm.xlu0 %1361, %v646_v48  }
  0x5f   : > { %808 = vperm.xlu1 %1362, %v650_v49   ;;  %803 = vperm.xlu0 %1361, %v649_v50  }
  0x68   : > { %v1580_v55 = vpop.permute.xlu2 %673 }
  0x70   : > { %v679_v1 = vpop.permute.xlu2 %678 }
  0x78   : > { %v694_v15 = vpop.permute.xlu2 %693 }
  0x80   : > { %v1641_v24 = vpop.permute.xlu2 %708 }
  0x81   : > { %v654_v51 = vpop.permute.xlu0 %653  ;;  %v664_v52 = vpop.permute.xlu1 %663 }
  0x88   : > { %v1659_v40 = vpop.permute.xlu2 %723 }
  0x89   : > { %v659_v57 = vpop.permute.xlu0 %658  ;;  %v669_v60 = vpop.permute.xlu1 %668 }
  0x90   : > { %v475_v53 = vpop.f32.mrf.mxu0  ;;  %v1578_v54 = vpop.f32.mrf.mxu1 }
  0x91   : > { %v1605_v5 = vpop.permute.xlu0 %683  ;;  %v1612_v8 = vpop.permute.xlu1 %688  ;;  %v811_v33 = vmul.f32 %v654_v51, %v475_v53 }
  0x93   : > { %v880_v38 = vmul.f32 %v811_v33, %v475_v53 }
  0x97   : > { %v1582_v56 = vpop.f32.mrf.mxu2  ;;  %v1584_v58 = vpop.f32.mrf.mxu3 }
  0x98   : > { %v477_v59 = vpop.f32.mrf.mxu0  ;;  %v1593_v62 = vpop.f32.mrf.mxu1 }
  0x99   : > { %v1241_v61 = vpack.c.bf16 %v477_v59, %v475_v53  ;;  %v1261_v63 = vpack.c.bf16 %v1593_v62, %v1578_v54  ;;  %v1623_v16 = vpop.permute.xlu0 %698  ;;  %v1627_v17 = vpop.permute.xlu1 %703  ;;  %v812_v28 = vmul.f32 %v659_v57, %v477_v59 }
  0x9b   : > { %1242 = vst [vmem:[%s1591_s11] sm:$0xff] %v1241_v61   ;;  %v881_v36 = vmul.f32 %v812_v28, %v477_v59  ;;  %v843_v41 = vadd.f32 %v812_v28, %v811_v33 }
  0x9c   : > { %1321 = vst [vmem:[%s1591_s11 + $0x20] sm:$0xff] %v1261_v63  }
  0x9d   : > { %v912_v46 = vadd.f32 %v881_v36, %v880_v38  ;;  %v820_v36 = vmul.f32 %v1623_v16, %v1593_v62 }
  0x9f   : > { %v1599_v0 = vpop.f32.mrf.mxu2  ;;  %v1603_v3 = vpop.f32.mrf.mxu3  ;;  %v889_v16 = vmul.f32 %v820_v36, %v1593_v62 }
  0xa0   : > { %v1281_v2 = vpack.c.bf16 %v1599_v0, %v1582_v56  ;;  %v480_v4 = vpop.f32.mrf.mxu0  ;;  %v1301_v6 = vpack.c.bf16 %v1603_v3, %v1584_v58  ;;  %v1610_v7 = vpop.f32.mrf.mxu1 }
  0xa1   : > { %v1643_v25 = vpop.permute.xlu0 %713  ;;  %v1647_v27 = vpop.permute.xlu1 %718  ;;  %v813_v35 = vmul.f32 %v664_v52, %v480_v4 }
  0xa2   : > { %1325 = vst [vmem:[%s1591_s11 + $0x40] sm:$0xff] %v1281_v2  }
  0xa3   : > { %1329 = vst [vmem:[%s1591_s11 + $0x60] sm:$0xff] %v1301_v6   ;;  %v882_v42 = vmul.f32 %v813_v35, %v480_v4  ;;  %v844_v49 = vadd.f32 %v843_v41, %v813_v35 }
  0xa5   : > { %v913_v59 = vadd.f32 %v912_v46, %v882_v42 }
  0xa7   : > { %v1615_v9 = vpop.f32.mrf.mxu2  ;;  %v1617_v10 = vpop.f32.mrf.mxu3 }
  0xa8   : > { %v482_v11 = vpop.f32.mrf.mxu0  ;;  %v1619_v13 = vpop.f32.mrf.mxu1 }
  0xa9   : > { %v1246_v12 = vpack.c.bf16 %v482_v11, %v480_v4  ;;  %v1266_v14 = vpack.c.bf16 %v1619_v13, %v1610_v7  ;;  %v814_v37 = vmul.f32 %v669_v60, %v482_v11  ;;  %v1661_v43 = vpop.permute.xlu0 %728  ;;  %v1673_v57 = vpop.permute.xlu1 %733  ;;  %v822_v46 = vmul.f32 %v1641_v24, %v1619_v13 }
  0xab   : > { %1318 = vst [vmem:[%s1591_s11 + $0x8] sm:$0xff] %v1246_v12   ;;  %v883_v50 = vmul.f32 %v814_v37, %v482_v11  ;;  %v891_v24 = vmul.f32 %v822_v46, %v1619_v13 }
  0xac   : > { %1322 = vst [vmem:[%s1591_s11 + $0x28] sm:$0xff] %v1266_v14   ;;  %v819_v14 = vmul.f32 %v694_v15, %v1578_v54 }
  0xad   : > { %v914_v63 = vadd.f32 %v913_v59, %v883_v50 }
  0xae   : > { %v888_v42 = vmul.f32 %v819_v14, %v1578_v54 }
  0xaf   : > { %v1629_v18 = vpop.f32.mrf.mxu2  ;;  %v1633_v20 = vpop.f32.mrf.mxu3 }
  0xb0   : > { %v1286_v19 = vpack.c.bf16 %v1629_v18, %v1615_v9  ;;  %v485_v21 = vpop.f32.mrf.mxu0  ;;  %v1306_v22 = vpack.c.bf16 %v1633_v20, %v1617_v10  ;;  %v1638_v23 = vpop.f32.mrf.mxu1 }
  0xb1   : > { %v815_v44 = vmul.f32 %v1580_v55, %v485_v21  ;;  %v845_v55 = vadd.f32 %v844_v49, %v814_v37  ;;  %v749_v41 = vpop.permute.xlu1 %748  ;;  %v823_v54 = vmul.f32 %v1643_v25, %v1638_v23 }
  0xb2   : > { %1326 = vst [vmem:[%s1591_s11 + $0x48] sm:$0xff] %v1286_v19  }
  0xb3   : > { %1330 = vst [vmem:[%s1591_s11 + $0x68] sm:$0xff] %v1306_v22   ;;  %v884_v60 = vmul.f32 %v815_v44, %v485_v21  ;;  %v846_v2 = vadd.f32 %v845_v55, %v815_v44  ;;  %v892_v25 = vmul.f32 %v823_v54, %v1638_v23 }
  0xb7   : > { %v1645_v26 = vpop.f32.mrf.mxu2  ;;  %v1649_v29 = vpop.f32.mrf.mxu3 }
  0xb8   : > { %v487_v30 = vpop.f32.mrf.mxu0  ;;  %v1651_v32 = vpop.f32.mrf.mxu1 }
  0xb9   : > { %v1251_v31 = vpack.c.bf16 %v487_v30, %v485_v21  ;;  %v1271_v34 = vpack.c.bf16 %v1651_v32, %v1638_v23  ;;  %v816_v51 = vmul.f32 %v679_v1, %v487_v30  ;;  %v915_v1 = vadd.f32 %v914_v63, %v884_v60  ;;  %v764_v13 = vpop.permute.xlu1 %763 }
  0xba   : > { %v824_v62 = vmul.f32 %v1647_v27, %v1651_v32 }
  0xbb   : > { %1319 = vst [vmem:[%s1591_s11 + $0x10] sm:$0xff] %v1251_v31   ;;  %v885_v4 = vmul.f32 %v816_v51, %v487_v30  ;;  %v847_v11 = vadd.f32 %v846_v2, %v816_v51  ;;  %v744_v30 = vpop.permute.xlu0 %743 }
  0xbc   : > { %1323 = vst [vmem:[%s1591_s11 + $0x30] sm:$0xff] %v1271_v34   ;;  %v739_v34 = vpop.permute.xlu2 %738 }
  0xbd   : > { %v916_v28 = vadd.f32 %v915_v1, %v885_v4 }
  0xbf   : > { %v1657_v39 = vpop.f32.mrf.mxu2  ;;  %v1666_v47 = vpop.f32.mrf.mxu3 }
  0xc0   : > { %v1291_v45 = vpack.c.bf16 %v1657_v39, %v1645_v26  ;;  %v490_v48 = vpop.f32.mrf.mxu0  ;;  %v1311_v52 = vpack.c.bf16 %v1666_v47, %v1649_v29  ;;  %v1671_v53 = vpop.f32.mrf.mxu1 }
  0xc1   : > { %v817_v61 = vmul.f32 %v1605_v5, %v490_v48  ;;  %v825_v4 = vmul.f32 %v1659_v40, %v1671_v53 }
  0xc2   : > { %1327 = vst [vmem:[%s1591_s11 + $0x50] sm:$0xff] %v1291_v45  }
  0xc3   : > { %1331 = vst [vmem:[%s1591_s11 + $0x70] sm:$0xff] %v1311_v52   ;;  %v886_v12 = vmul.f32 %v817_v61, %v490_v48  ;;  %v848_v21 = vadd.f32 %v847_v11, %v817_v61  ;;  %v759_v2 = vpop.permute.xlu0 %758 }
  0xc5   : > { %v917_v37 = vadd.f32 %v916_v28, %v886_v12  ;;  %v893_v12 = vmul.f32 %v824_v62, %v1651_v32  ;;  %v827_v28 = vmul.f32 %v1673_v57, %v1582_v56  ;;  %v829_v32 = vmul.f32 %v744_v30, %v1615_v9 }
  0xc6   : > { %v830_v57 = vmul.f32 %v749_v41, %v1629_v18  ;;  %v832_v30 = vmul.f32 %v759_v2, %v1657_v39 }
  0xc7   : > { %v1677_v6 = vpop.f32.mrf.mxu2  ;;  %v1680_v19 = vpop.f32.mrf.mxu3 }
  0xc8   : > { %v492_v22 = vpop.f32.mrf.mxu0  ;;  %v512_v33 = vpop.f32.mrf.mxu1 }
  0xc9   : > { %v1256_v31 = vpack.c.bf16 %v492_v22, %v490_v48  ;;  %v818_v5 = vmul.f32 %v1612_v8, %v492_v22  ;;  %v1276_v35 = vpack.c.bf16 %v512_v33, %v1671_v53  ;;  %v821_v8 = vmul.f32 %v1627_v17, %v1610_v7 }
  0xca   : > { %v826_v27 = vmul.f32 %v1661_v43, %v512_v33 }
  0xcb   : > { %1320 = vst [vmem:[%s1591_s11 + $0x18] sm:$0xff] %v1256_v31   ;;  %v849_v15 = vadd.f32 %v848_v21, %v818_v5  ;;  %v887_v38 = vmul.f32 %v818_v5, %v492_v22  ;;  %v890_v52 = vmul.f32 %v821_v8, %v1610_v7  ;;  %v754_v7 = vpop.permute.xlu2 %753  ;;  %v894_v21 = vmul.f32 %v825_v4, %v1671_v53 }
  0xcc   : > { %1324 = vst [vmem:[%s1591_s11 + $0x38] sm:$0xff] %v1276_v35   ;;  %v828_v5 = vmul.f32 %v739_v34, %v1599_v0  ;;  %v895_v35 = vmul.f32 %v826_v27, %v512_v33  ;;  %v898_v34 = vmul.f32 %v829_v32, %v1615_v9  ;;  %v831_v33 = vmul.f32 %v754_v7, %v1645_v26 }
  0xcd   : > { %v850_v44 = vadd.f32 %v849_v15, %v819_v14  ;;  %v918_v45 = vadd.f32 %v917_v37, %v887_v38  ;;  %v896_v37 = vmul.f32 %v827_v28, %v1582_v56  ;;  %v899_v56 = vmul.f32 %v830_v57, %v1629_v18 }
  0xcf   : > { %v1693_v48 = vpop.f32.mrf.mxu2  ;;  %v851_v49 = vadd.f32 %v850_v44, %v820_v36  ;;  %v919_v50 = vadd.f32 %v918_v45, %v888_v42  ;;  %v1703_v55 = vpop.f32.mrf.mxu3 }
  0xd0   : > { %v1296_v51 = vpack.c.bf16 %v1693_v48, %v1677_v6  ;;  %v1316_v63 = vpack.c.bf16 %v1703_v55, %v1680_v19  ;;  %v774_v42 = vpop.permute.xlu0 %773  ;;  %v779_v45 = vpop.permute.xlu1 %778 }
  0xd1   : > { %v852_v17 = vadd.f32 %v851_v49, %v821_v8  ;;  %v920_v59 = vadd.f32 %v919_v50, %v889_v16  ;;  %v897_v8 = vmul.f32 %v828_v5, %v1599_v0  ;;  %v833_v0 = vmul.f32 %v764_v13, %v1677_v6 }
  0xd2   : > { %1328 = vst [vmem:[%s1591_s11 + $0x58] sm:$0xff] %v1296_v51   ;;  %v900_v51 = vmul.f32 %v831_v33, %v1645_v26  ;;  %v835_v18 = vmul.f32 %v774_v42, %v1584_v58  ;;  %v836_v26 = vmul.f32 %v779_v45, %v1603_v3 }
  0xd3   : > { %v921_v60 = vadd.f32 %v920_v59, %v890_v52  ;;  %v853_v61 = vadd.f32 %v852_v17, %v822_v46  ;;  %1332 = vst [vmem:[%s1591_s11 + $0x78] sm:$0xff] %v1316_v63   ;;  %v769_v38 = vpop.permute.xlu2 %768 }
  0xd4   : > { %v834_v9 = vmul.f32 %v769_v38, %v1693_v48 }
  0xd5   : > { %v854_v1 = vadd.f32 %v853_v61, %v823_v54  ;;  %v922_v11 = vadd.f32 %v921_v60, %v891_v24  ;;  %v901_v54 = vmul.f32 %v832_v30, %v1657_v39  ;;  %v902_v60 = vmul.f32 %v833_v0, %v1677_v6 }
  0xd7   : > { %v855_v14 = vadd.f32 %v854_v1, %v824_v62  ;;  %v923_v22 = vadd.f32 %v922_v11, %v892_v25  ;;  %v903_v25 = vmul.f32 %v834_v9, %v1693_v48  ;;  %v904_v1 = vmul.f32 %v835_v18, %v1584_v58 }
  0xd8   : > { %v789_v62 = vpop.permute.xlu0 %788  ;;  %v794_v7 = vpop.permute.xlu1 %793 }
  0xd9   : > { %v856_v31 = vadd.f32 %v855_v14, %v825_v4  ;;  %v924_v23 = vadd.f32 %v923_v22, %v893_v12  ;;  %v905_v12 = vmul.f32 %v836_v26, %v1603_v3 }
  0xdb   : > { %v857_v40 = vadd.f32 %v856_v31, %v826_v27  ;;  %v925_v36 = vadd.f32 %v924_v23, %v894_v21  ;;  %v784_v24 = vpop.permute.xlu2 %783  ;;  %v838_v27 = vmul.f32 %v789_v62, %v1633_v20 }
  0xdc   : > { %v837_v39 = vmul.f32 %v784_v24, %v1617_v10 }
  0xdd   : > { %v858_v15 = vadd.f32 %v857_v40, %v827_v28  ;;  %v926_v43 = vadd.f32 %v925_v36, %v895_v35  ;;  %v839_v28 = vmul.f32 %v794_v7, %v1649_v29  ;;  %v907_v58 = vmul.f32 %v838_v27, %v1633_v20 }
  0xde   : > { %v906_v22 = vmul.f32 %v837_v39, %v1617_v10 }
  0xdf   : > { %v859_v53 = vadd.f32 %v858_v15, %v828_v5  ;;  %v927_v44 = vadd.f32 %v926_v43, %v896_v37  ;;  %v908_v3 = vmul.f32 %v839_v28, %v1649_v29 }
  0xe0   : > { %v804_v23 = vpop.permute.xlu0 %803  ;;  %v809_v36 = vpop.permute.xlu1 %808 }
  0xe1   : > { %v860_v46 = vadd.f32 %v859_v53, %v829_v32  ;;  %v928_v16 = vadd.f32 %v927_v44, %v897_v8  ;;  %v841_v37 = vmul.f32 %v804_v23, %v1680_v19  ;;  %v842_v43 = vmul.f32 %v809_v36, %v1703_v55 }
  0xe3   : > { %v929_v49 = vadd.f32 %v928_v16, %v898_v34  ;;  %v861_v50 = vadd.f32 %v860_v46, %v830_v57  ;;  %v799_v48 = vpop.permute.xlu2 %798  ;;  %v910_v8 = vmul.f32 %v841_v37, %v1680_v19  ;;  %v911_v44 = vmul.f32 %v842_v43, %v1703_v55 }
  0xe4   : > { %v840_v5 = vmul.f32 %v799_v48, %v1666_v47 }
  0xe5   : > { %v862_v41 = vadd.f32 %v861_v50, %v831_v33  ;;  %v930_v52 = vadd.f32 %v929_v49, %v899_v56 }
  0xe6   : > { %v909_v10 = vmul.f32 %v840_v5, %v1666_v47 }
  0xe7   : > { %v863_v17 = vadd.f32 %v862_v41, %v832_v30  ;;  %v931_v59 = vadd.f32 %v930_v52, %v900_v51 }
  0xe9   : > { %v864_v61 = vadd.f32 %v863_v17, %v833_v0  ;;  %v932_v63 = vadd.f32 %v931_v59, %v901_v54 }
  0xeb   : > { %v865_v2 = vadd.f32 %v864_v61, %v834_v9  ;;  %v933_v4 = vadd.f32 %v932_v63, %v902_v60 }
  0xed   : > { %v866_v11 = vadd.f32 %v865_v2, %v835_v18  ;;  %v934_v13 = vadd.f32 %v933_v4, %v903_v25 }
  0xef   : > { %v867_v6 = vadd.f32 %v866_v11, %v836_v26  ;;  %v935_v14 = vadd.f32 %v934_v13, %v904_v1 }
  0xf1   : > { %v868_v21 = vadd.f32 %v867_v6, %v837_v39  ;;  %v936_v31 = vadd.f32 %v935_v14, %v905_v12 }
  0xf3   : > { %v937_v40 = vadd.f32 %v936_v31, %v906_v22  ;;  %v869_v35 = vadd.f32 %v868_v21, %v838_v27 }
  0xf5   : > { %v870_v32 = vadd.f32 %v869_v35, %v839_v28  ;;  %v938_v15 = vadd.f32 %v937_v40, %v907_v58 }
  0xf7   : > { %v871_v38 = vadd.f32 %v870_v32, %v840_v5  ;;  %v939_v42 = vadd.f32 %v938_v15, %v908_v3 }
  0xf9   : > { %v872_v57 = vadd.f32 %v871_v38, %v841_v37  ;;  %v940_v20 = vadd.f32 %v939_v42, %v909_v10 }
  0xfb   : > { %v873_v53 = vadd.f32 %v872_v57, %v842_v43  ;;  %v941_v45 = vadd.f32 %v940_v20, %v910_v8 }
  0xfd   : > { %v874_v29 = vrot.slane %v873_v53, 4  ;;  %v942_v34 = vadd.f32 %v941_v45, %v911_v44 }
  0xff   : > { %v875_v33 = vadd.f32 %v874_v29, %v873_v53  ;;  %v943_v46 = vrot.slane %v942_v34, 4 }
 0x101   : > { %v876_v16 = vrot.slane %v875_v33, 2  ;;  %v944_v56 = vadd.f32 %v943_v46, %v942_v34 }
 0x103   : > { %v877_v47 = vadd.f32 %v876_v16, %v875_v33  ;;  %v945_v30 = vrot.slane %v944_v56, 2 }
 0x105   : > { %v878_v49 = vrot.slane %v877_v47, 1  ;;  %v946_v50 = vadd.f32 %v945_v30, %v944_v56 }
 0x107   : > { %v879_v19 = vadd.f32 %v878_v49, %v877_v47  ;;  %v947_v51 = vrot.slane %v946_v50, 1 }
 0x109   : > { %v948_v55 = vadd.f32 %v947_v51, %v946_v50  ;;  %949 = vst [vmem:[%s291_s13] sm:$0xff] %v879_v19 }
 0x10b   : > { %950 = vst [vmem:[%s298_s16] sm:$0xff] %v948_v55 }
 0x10c PF: > { %s16_s20 = sadd.s32 1, %s1386_s20   ;;  %s1771_s18 = smov %s1382_s19 }
 0x10d   : > { %p13_p5 = scmp.ge.s32.totalorder %s16_s20, 4   ;;  %s1772_s19 = smov %s1774_s21 }
 0x10f   :  { %15 = sbr.rel (!%p13_p5) target bundleno = 2 (0x2), region = 89 }

</bundles_post_ra>
